<compile_context>
chip_gen: v6e
topology: v6e:2x2x1
jax: 0.10.0
libtpu: 0.0.40
codegen_flags: <defaults>
</compile_context>

<pallas_src>
import functools

import jax
import jax.numpy as jnp
from jax import lax
from jax.experimental import pallas as pl
from jax.experimental.pallas import tpu as pltpu


def _hardswish(x):
    return x * jnp.clip(x + 3.0, 0.0, 6.0) * (1.0 / 6.0)


def _hardsigmoid(x):
    return jnp.clip(x + 3.0, 0.0, 6.0) * (1.0 / 6.0)


# --------------------------- fused kernel (one batch element per grid step) ----
def fused_inverted_residual_kernel(
        x_ref,      # (1, Cin, HW)  NCHW-flattened input, lane-dense
        w1_ref,     # (Cin, Cexp)   expand weight   (BN scale folded in)
        b1_ref,     # (1, Cexp)     expand BN bias
        wd_ref,     # (K*K, Cexp)   depthwise weight (BN scale folded in)
        b2_ref,     # (1, Cexp)     depthwise BN bias
        wse1_ref,   # (Cexp, Csq)   SE fc1 weight
        bse1_ref,   # (1, Csq)      SE fc1 bias
        wse2_ref,   # (Csq, Cexp)   SE fc2 weight
        bse2_ref,   # (1, Cexp)     SE fc2 bias
        w3t_ref,    # (Cout, Cexp)  project weight, transposed (BN scale folded in)
        b3_ref,     # (Cout, 1)     project BN bias (channel-major)
        o_ref,      # (1, Cout, HW) NCHW-flattened output, lane-dense
        pad_ref,    # VMEM scratch (H+2p, W+2p, Cexp): zero-padded depthwise input
        *, H, W, K):
    HW = H * W
    Cexp = w1_ref.shape[1]
    pad = (K - 1) // 2

    x_cm = x_ref[0]                                          # (Cin, HW)

    # ---- expand: 1x1 conv as matmul + bias + hardswish ------------------------
    x_sm = x_cm.T                                            # (HW, Cin)  small in-VMEM transpose
    y = jnp.dot(x_sm, w1_ref[...], preferred_element_type=jnp.float32)
    y = _hardswish(y + b1_ref[...])                          # (HW, Cexp)

    # ---- depthwise KxK (stride 1, zero padding via VMEM scratch) --------------
    # Re-zero the whole scratch each step (border must be 0; cheap, all in VMEM
    # and safe even when the grid is split across TensorCores).
    pad_ref[...] = jnp.zeros_like(pad_ref)
    pad_ref[pl.ds(pad, H), pl.ds(pad, W), :] = y.reshape(H, W, Cexp)
    wd = wd_ref[...]                                         # (K*K, Cexp)
    acc = jnp.zeros((H, W, Cexp), jnp.float32)
    for kw in range(K):                                      # 3 kw-shifted plane loads
        plane = pad_ref[:, pl.ds(kw, W), :]                  # (H+2p, W, Cexp)
        for kh in range(K):                                  # cheap outer-dim slices
            tap = kh * K + kw
            acc = acc + plane[kh:kh + H] * wd[tap:tap + 1, :]
    y2 = _hardswish(acc + b2_ref[...])                       # (H, W, Cexp)

    # ---- squeeze-and-excitation (ReLU delta, Hardsigmoid sigma) ---------------
    pooled = jnp.mean(y2, axis=(0, 1))[None, :]              # (1, Cexp)
    h = jnp.dot(pooled, wse1_ref[...], preferred_element_type=jnp.float32)
    h = jnp.maximum(h + bse1_ref[...], 0.0)                  # (1, Csq)
    sc = jnp.dot(h, wse2_ref[...], preferred_element_type=jnp.float32)
    sc = _hardsigmoid(sc + bse2_ref[...])                    # (1, Cexp)
    y2s = y2.reshape(HW, Cexp) * sc                          # (HW, Cexp)

    # ---- project (channel-major => lane-dense NCHW store) + residual ----------
    out_cm = lax.dot_general(w3t_ref[...], y2s,
                             (((1,), (1,)), ((), ())),       # contract Cexp with Cexp
                             preferred_element_type=jnp.float32)   # (Cout, HW)
    o_ref[0] = out_cm + b3_ref[...] + x_cm                   # residual: Cin == Cout


# --------------------------- wrapper ------------------------------------------
def inverted_residual(x_nchw, p, *, K=3):
    """Fused InvertedResidual forward.  x_nchw: (N, Cin, H, W) float32 (NCHW)."""
    N, Cin, H, W = x_nchw.shape
    Cexp = p['w1'].shape[1]
    Cout = p['w3'].shape[1]
    Csq = p['wse1'].shape[1]
    HW = H * W
    pad = (K - 1) // 2
    assert Cin == Cout, "this config uses the residual connection (Cin == Cout)"

    # Fold eval-mode BN scales into the conv weights (biases stay in-kernel).
    w1f = (p['w1'] * p['s1']).astype(jnp.float32)                     # (Cin, Cexp)
    wdf = (p['wd'] * p['s2']).reshape(K * K, Cexp).astype(jnp.float32)
    w3tf = (p['w3'] * p['s3']).T.astype(jnp.float32)                  # (Cout, Cexp)
    b3cm = p['b3'].reshape(Cout, 1).astype(jnp.float32)               # (Cout, 1)

    x_cm = x_nchw.astype(jnp.float32).reshape(N, Cin, HW)             # free reshape

    kernel = functools.partial(fused_inverted_residual_kernel, H=H, W=W, K=K)
    full2d = lambda r, c: pl.BlockSpec((r, c), lambda n: (0, 0))

    out_cm = pl.pallas_call(
        kernel,
        out_shape=jax.ShapeDtypeStruct((N, Cout, HW), jnp.float32),
        grid=(N,),
        in_specs=[
            pl.BlockSpec((1, Cin, HW), lambda n: (n, 0, 0)),
            full2d(Cin, Cexp),       # w1 (scale-folded)
            full2d(1, Cexp),         # b1
            full2d(K * K, Cexp),     # wd (scale-folded)
            full2d(1, Cexp),         # b2
            full2d(Cexp, Csq),       # wse1
            full2d(1, Csq),          # bse1
            full2d(Csq, Cexp),       # wse2
            full2d(1, Cexp),         # bse2
            full2d(Cout, Cexp),      # w3^T (scale-folded)
            full2d(Cout, 1),         # b3 (channel-major)
        ],
        out_specs=pl.BlockSpec((1, Cout, HW), lambda n: (n, 0, 0)),
        scratch_shapes=[pltpu.VMEM((H + 2 * pad, W + 2 * pad, Cexp), jnp.float32)],
        compiler_params=pltpu.CompilerParams(dimension_semantics=("parallel",)),
    )(x_cm, w1f, p['b1'], wdf, p['b2'],
      p['wse1'], p['bse1'], p['wse2'], p['bse2'], w3tf, b3cm)

    return out_cm.reshape(N, Cout, H, W)                              # free reshape


# --------------------------- deterministic parameter construction --------------
def make_params(key, Cin, Cexp, Cout, Csq, K):
    ks = jax.random.split(key, 10)

    def bn_fold(kg, C):
        k1, k2, k3, k4 = jax.random.split(kg, 4)
        gamma = 1.0 + 0.1 * jax.random.normal(k1, (C,), jnp.float32)
        beta = 0.1 * jax.random.normal(k2, (C,), jnp.float32)
        mean = 0.1 * jax.random.normal(k3, (C,), jnp.float32)
        var = 1.0 + 0.1 * jax.random.uniform(k4, (C,), jnp.float32)
        eps = 1e-3  # MobileNetV3 uses BatchNorm2d(eps=0.001)
        scale = gamma / jnp.sqrt(var + eps)
        bias = beta - mean * scale
        return scale.reshape(1, C), bias.reshape(1, C)

    w1 = 0.3 * jax.random.normal(ks[0], (Cin, Cexp), jnp.float32)
    s1, b1 = bn_fold(ks[1], Cexp)
    wd = 0.3 * jax.random.normal(ks[2], (K, K, Cexp), jnp.float32)
    s2, b2 = bn_fold(ks[3], Cexp)
    wse1 = 0.3 * jax.random.normal(ks[4], (Cexp, Csq), jnp.float32)
    bse1 = 0.1 * jax.random.normal(ks[5], (1, Csq), jnp.float32)
    wse2 = 0.3 * jax.random.normal(ks[6], (Csq, Cexp), jnp.float32)
    bse2 = 0.1 * jax.random.normal(ks[7], (1, Cexp), jnp.float32)
    w3 = 0.3 * jax.random.normal(ks[8], (Cexp, Cout), jnp.float32)
    s3, b3 = bn_fold(ks[9], Cout)
    return dict(w1=w1, s1=s1, b1=b1, wd=wd, s2=s2, b2=b2,
                wse1=wse1, bse1=bse1, wse2=wse2, bse2=bse2,
                w3=w3, s3=s3, b3=b3)


# --------------------------- pure-JAX reference (correctness check) ------------
def reference(x_nchw, p, K=3):
    hp = lax.Precision.HIGHEST
    x = jnp.transpose(x_nchw, (0, 2, 3, 1)).astype(jnp.float32)      # NHWC
    Cexp = p['w1'].shape[1]
    y = jnp.einsum('nhwc,cd->nhwd', x, p['w1'], precision=hp) * p['s1'] + p['b1']
    y = _hardswish(y)
    wd4 = p['wd'][:, :, None, :]                                     # HWIO, I=1
    y2 = lax.conv_general_dilated(y, wd4, (1, 1), 'SAME',
                                  dimension_numbers=('NHWC', 'HWIO', 'NHWC'),
                                  feature_group_count=Cexp, precision=hp)
    y2 = _hardswish(y2 * p['s2'] + p['b2'])
    pooled = jnp.mean(y2, axis=(1, 2))
    h = jnp.maximum(jnp.dot(pooled, p['wse1'], precision=hp) + p['bse1'], 0.0)
    sc = _hardsigmoid(jnp.dot(h, p['wse2'], precision=hp) + p['bse2'])
    y2 = y2 * sc[:, None, None, :]
    out = jnp.einsum('nhwc,cd->nhwd', y2, p['w3'], precision=hp) * p['s3'] + p['b3']
    out = out + x
    return jnp.transpose(out, (0, 3, 1, 2))


if __name__ == "__main__":
    N, Cin, H, W = 2, 16, 16, 16
    Cexp, Cout, Csq, K = 64, 16, 16, 3

    key = jax.random.PRNGKey(0)
    kx, kp = jax.random.split(key)
    x = jax.random.normal(kx, (N, Cin, H, W), jnp.float32)           # NCHW input
    params = make_params(kp, Cin, Cexp, Cout, Csq, K)

    out = jax.block_until_ready(inverted_residual(x, params, K=K))
    assert out.shape == (N, Cout, H, W)

    ref = jax.block_until_ready(reference(x, params, K=K))
    max_err = float(jnp.max(jnp.abs(out - ref)))
    # f32 end-to-end; tolerance leaves headroom for MXU multi-pass f32 matmul
    # accumulation-order differences vs. the XLA reference.
    if max_err > 5e-2:
        raise AssertionError(f"Pallas result mismatch, max abs err = {max_err}")

    print("KERNEL_OK")
</pallas_src>

<mosaic_0001>
module attributes {stable_mosaic.version = 11 : i64} {
  func.func @fused_inverted_residual_kernel(%arg0: i32, %arg1: memref<1x16x256xf32, #tpu.memory_space<vmem>>, %arg2: memref<16x64xf32, #tpu.memory_space<vmem>>, %arg3: memref<1x64xf32, #tpu.memory_space<vmem>>, %arg4: memref<9x64xf32, #tpu.memory_space<vmem>>, %arg5: memref<1x64xf32, #tpu.memory_space<vmem>>, %arg6: memref<64x16xf32, #tpu.memory_space<vmem>>, %arg7: memref<1x16xf32, #tpu.memory_space<vmem>>, %arg8: memref<16x64xf32, #tpu.memory_space<vmem>>, %arg9: memref<1x64xf32, #tpu.memory_space<vmem>>, %arg10: memref<16x64xf32, #tpu.memory_space<vmem>>, %arg11: memref<16x1xf32, #tpu.memory_space<vmem>>, %arg12: memref<1x16x256xf32, #tpu.memory_space<vmem>>, %arg13: memref<18x18x64xf32, #tpu.memory_space<vmem>>) attributes {dimension_semantics = [#tpu.dimension_semantics<parallel>], iteration_bounds = array<i64: 2>, scalar_prefetch = 0 : i64, scratch_operands = 1 : i64, tpu.core_type = #tpu.core_type<tc>, window_params = [{transform_indices = @transform_0, window_bounds = array<i64: 1, 16, 256>}, {pipeline_mode = #tpu.pipeline_mode<synchronous>, transform_indices = @transform_1, window_bounds = array<i64: 16, 64>}, {pipeline_mode = #tpu.pipeline_mode<synchronous>, transform_indices = @transform_2, window_bounds = array<i64: 1, 64>}, {pipeline_mode = #tpu.pipeline_mode<synchronous>, transform_indices = @transform_3, window_bounds = array<i64: 9, 64>}, {pipeline_mode = #tpu.pipeline_mode<synchronous>, transform_indices = @transform_4, window_bounds = array<i64: 1, 64>}, {pipeline_mode = #tpu.pipeline_mode<synchronous>, transform_indices = @transform_5, window_bounds = array<i64: 64, 16>}, {pipeline_mode = #tpu.pipeline_mode<synchronous>, transform_indices = @transform_6, window_bounds = array<i64: 1, 16>}, {pipeline_mode = #tpu.pipeline_mode<synchronous>, transform_indices = @transform_7, window_bounds = array<i64: 16, 64>}, {pipeline_mode = #tpu.pipeline_mode<synchronous>, transform_indices = @transform_8, window_bounds = array<i64: 1, 64>}, {pipeline_mode = #tpu.pipeline_mode<synchronous>, transform_indices = @transform_9, window_bounds = array<i64: 16, 64>}, {pipeline_mode = #tpu.pipeline_mode<synchronous>, transform_indices = @transform_10, window_bounds = array<i64: 16, 1>}, {transform_indices = @transform_11, window_bounds = array<i64: 1, 16, 256>}]} {
    %c0 = arith.constant 0 : index
    %c0_0 = arith.constant 0 : index
    %c0_1 = arith.constant 0 : index
    %0 = vector.load %arg1[%c0, %c0_0, %c0_1] : memref<1x16x256xf32, #tpu.memory_space<vmem>>, vector<1x16x256xf32>
    %1 = vector.shape_cast %0 : vector<1x16x256xf32> to vector<16x256xf32>
    %2 = tpu.transpose %1, [1, 0] : vector<16x256xf32> -> vector<256x16xf32>
    %c0_2 = arith.constant 0 : index
    %c0_3 = arith.constant 0 : index
    %3 = vector.load %arg2[%c0_2, %c0_3] : memref<16x64xf32, #tpu.memory_space<vmem>>, vector<16x64xf32>
    %cst = arith.constant dense<0.000000e+00> : vector<256x64xf32>
    %4 = tpu.matmul %2, %3, %cst {dimension_numbers = #tpu.dot_dimension_numbers<[1], [0], [0], [1], [0, 0, 1, 1], [], []>} : vector<256x16xf32>, vector<16x64xf32>, vector<256x64xf32> -> vector<256x64xf32>
    %c0_4 = arith.constant 0 : index
    %c0_5 = arith.constant 0 : index
    %5 = vector.load %arg3[%c0_4, %c0_5] : memref<1x64xf32, #tpu.memory_space<vmem>>, vector<1x64xf32>
    %6 = vector.broadcast %5 : vector<1x64xf32> to vector<256x64xf32>
    %7 = arith.addf %4, %6 : vector<256x64xf32>
    %cst_6 = arith.constant 3.000000e+00 : f32
    %8 = vector.broadcast %cst_6 : f32 to vector<256x64xf32>
    %9 = arith.addf %7, %8 : vector<256x64xf32>
    %cst_7 = arith.constant 0.000000e+00 : f32
    %cst_8 = arith.constant 6.000000e+00 : f32
    %10 = vector.broadcast %cst_7 : f32 to vector<256x64xf32>
    %11 = arith.maximumf %10, %9 : vector<256x64xf32>
    %12 = vector.broadcast %cst_8 : f32 to vector<256x64xf32>
    %13 = arith.minimumf %12, %11 : vector<256x64xf32>
    %14 = arith.mulf %7, %13 : vector<256x64xf32>
    %cst_9 = arith.constant 0.166666672 : f32
    %15 = vector.broadcast %cst_9 : f32 to vector<256x64xf32>
    %16 = arith.mulf %14, %15 : vector<256x64xf32>
    %cst_10 = arith.constant 0.000000e+00 : f32
    %17 = vector.broadcast %cst_10 : f32 to vector<18x18x64xf32>
    %c0_11 = arith.constant 0 : index
    %c0_12 = arith.constant 0 : index
    %c0_13 = arith.constant 0 : index
    %18 = vector.load %arg13[%c0_11, %c0_12, %c0_13] : memref<18x18x64xf32, #tpu.memory_space<vmem>>, vector<18x18x64xf32>
    tpu.vector_store %arg13[%c0_11, %c0_12, %c0_13], %17 {strides = array<i32>} : memref<18x18x64xf32, #tpu.memory_space<vmem>>, vector<18x18x64xf32>,
    %19 = vector.shape_cast %16 : vector<256x64xf32> to vector<16x16x64xf32>
    %c1 = arith.constant 1 : index
    %c1_14 = arith.constant 1 : index
    %c0_15 = arith.constant 0 : index
    %20 = vector.load %arg13[%c1, %c1_14, %c0_15] : memref<18x18x64xf32, #tpu.memory_space<vmem>>, vector<16x16x64xf32>
    tpu.vector_store %arg13[%c1, %c1_14, %c0_15], %19 {strides = array<i32>} : memref<18x18x64xf32, #tpu.memory_space<vmem>>, vector<16x16x64xf32>,
    %c0_16 = arith.constant 0 : index
    %c0_17 = arith.constant 0 : index
    %21 = vector.load %arg4[%c0_16, %c0_17] : memref<9x64xf32, #tpu.memory_space<vmem>>, vector<9x64xf32>
    %cst_18 = arith.constant 0.000000e+00 : f32
    %22 = vector.broadcast %cst_18 : f32 to vector<16x16x64xf32>
    %c0_19 = arith.constant 0 : index
    %c0_20 = arith.constant 0 : index
    %c0_21 = arith.constant 0 : index
    %23 = vector.load %arg13[%c0_19, %c0_20, %c0_21] : memref<18x18x64xf32, #tpu.memory_space<vmem>>, vector<18x16x64xf32>
    %24 = vector.extract_strided_slice %23 {offsets = [0, 0, 0], sizes = [16, 16, 64], strides = [1, 1, 1]} : vector<18x16x64xf32> to vector<16x16x64xf32>
    %25 = vector.extract_strided_slice %21 {offsets = [0, 0], sizes = [1, 64], strides = [1, 1]} : vector<9x64xf32> to vector<1x64xf32>
    %26 = vector.shape_cast %25 : vector<1x64xf32> to vector<1x1x64xf32>
    %27 = vector.broadcast %26 : vector<1x1x64xf32> to vector<16x16x64xf32>
    %28 = arith.mulf %24, %27 : vector<16x16x64xf32>
    %29 = arith.addf %22, %28 : vector<16x16x64xf32>
    %30 = vector.extract_strided_slice %23 {offsets = [1, 0, 0], sizes = [16, 16, 64], strides = [1, 1, 1]} : vector<18x16x64xf32> to vector<16x16x64xf32>
    %31 = vector.extract_strided_slice %21 {offsets = [3, 0], sizes = [1, 64], strides = [1, 1]} : vector<9x64xf32> to vector<1x64xf32>
    %32 = vector.shape_cast %31 : vector<1x64xf32> to vector<1x1x64xf32>
    %33 = vector.broadcast %32 : vector<1x1x64xf32> to vector<16x16x64xf32>
    %34 = arith.mulf %30, %33 : vector<16x16x64xf32>
    %35 = arith.addf %29, %34 : vector<16x16x64xf32>
    %36 = vector.extract_strided_slice %23 {offsets = [2, 0, 0], sizes = [16, 16, 64], strides = [1, 1, 1]} : vector<18x16x64xf32> to vector<16x16x64xf32>
    %37 = vector.extract_strided_slice %21 {offsets = [6, 0], sizes = [1, 64], strides = [1, 1]} : vector<9x64xf32> to vector<1x64xf32>
    %38 = vector.shape_cast %37 : vector<1x64xf32> to vector<1x1x64xf32>
    %39 = vector.broadcast %38 : vector<1x1x64xf32> to vector<16x16x64xf32>
    %40 = arith.mulf %36, %39 : vector<16x16x64xf32>
    %41 = arith.addf %35, %40 : vector<16x16x64xf32>
    %c0_22 = arith.constant 0 : index
    %c1_23 = arith.constant 1 : index
    %c0_24 = arith.constant 0 : index
    %42 = vector.load %arg13[%c0_22, %c1_23, %c0_24] : memref<18x18x64xf32, #tpu.memory_space<vmem>>, vector<18x16x64xf32>
    %43 = vector.extract_strided_slice %42 {offsets = [0, 0, 0], sizes = [16, 16, 64], strides = [1, 1, 1]} : vector<18x16x64xf32> to vector<16x16x64xf32>
    %44 = vector.extract_strided_slice %21 {offsets = [1, 0], sizes = [1, 64], strides = [1, 1]} : vector<9x64xf32> to vector<1x64xf32>
    %45 = vector.shape_cast %44 : vector<1x64xf32> to vector<1x1x64xf32>
    %46 = vector.broadcast %45 : vector<1x1x64xf32> to vector<16x16x64xf32>
    %47 = arith.mulf %43, %46 : vector<16x16x64xf32>
    %48 = arith.addf %41, %47 : vector<16x16x64xf32>
    %49 = vector.extract_strided_slice %42 {offsets = [1, 0, 0], sizes = [16, 16, 64], strides = [1, 1, 1]} : vector<18x16x64xf32> to vector<16x16x64xf32>
    %50 = vector.extract_strided_slice %21 {offsets = [4, 0], sizes = [1, 64], strides = [1, 1]} : vector<9x64xf32> to vector<1x64xf32>
    %51 = vector.shape_cast %50 : vector<1x64xf32> to vector<1x1x64xf32>
    %52 = vector.broadcast %51 : vector<1x1x64xf32> to vector<16x16x64xf32>
    %53 = arith.mulf %49, %52 : vector<16x16x64xf32>
    %54 = arith.addf %48, %53 : vector<16x16x64xf32>
    %55 = vector.extract_strided_slice %42 {offsets = [2, 0, 0], sizes = [16, 16, 64], strides = [1, 1, 1]} : vector<18x16x64xf32> to vector<16x16x64xf32>
    %56 = vector.extract_strided_slice %21 {offsets = [7, 0], sizes = [1, 64], strides = [1, 1]} : vector<9x64xf32> to vector<1x64xf32>
    %57 = vector.shape_cast %56 : vector<1x64xf32> to vector<1x1x64xf32>
    %58 = vector.broadcast %57 : vector<1x1x64xf32> to vector<16x16x64xf32>
    %59 = arith.mulf %55, %58 : vector<16x16x64xf32>
    %60 = arith.addf %54, %59 : vector<16x16x64xf32>
    %c0_25 = arith.constant 0 : index
    %c2 = arith.constant 2 : index
    %c0_26 = arith.constant 0 : index
    %61 = vector.load %arg13[%c0_25, %c2, %c0_26] : memref<18x18x64xf32, #tpu.memory_space<vmem>>, vector<18x16x64xf32>
    %62 = vector.extract_strided_slice %61 {offsets = [0, 0, 0], sizes = [16, 16, 64], strides = [1, 1, 1]} : vector<18x16x64xf32> to vector<16x16x64xf32>
    %63 = vector.extract_strided_slice %21 {offsets = [2, 0], sizes = [1, 64], strides = [1, 1]} : vector<9x64xf32> to vector<1x64xf32>
    %64 = vector.shape_cast %63 : vector<1x64xf32> to vector<1x1x64xf32>
    %65 = vector.broadcast %64 : vector<1x1x64xf32> to vector<16x16x64xf32>
    %66 = arith.mulf %62, %65 : vector<16x16x64xf32>
    %67 = arith.addf %60, %66 : vector<16x16x64xf32>
    %68 = vector.extract_strided_slice %61 {offsets = [1, 0, 0], sizes = [16, 16, 64], strides = [1, 1, 1]} : vector<18x16x64xf32> to vector<16x16x64xf32>
    %69 = vector.extract_strided_slice %21 {offsets = [5, 0], sizes = [1, 64], strides = [1, 1]} : vector<9x64xf32> to vector<1x64xf32>
    %70 = vector.shape_cast %69 : vector<1x64xf32> to vector<1x1x64xf32>
    %71 = vector.broadcast %70 : vector<1x1x64xf32> to vector<16x16x64xf32>
    %72 = arith.mulf %68, %71 : vector<16x16x64xf32>
    %73 = arith.addf %67, %72 : vector<16x16x64xf32>
    %74 = vector.extract_strided_slice %61 {offsets = [2, 0, 0], sizes = [16, 16, 64], strides = [1, 1, 1]} : vector<18x16x64xf32> to vector<16x16x64xf32>
    %75 = vector.extract_strided_slice %21 {offsets = [8, 0], sizes = [1, 64], strides = [1, 1]} : vector<9x64xf32> to vector<1x64xf32>
    %76 = vector.shape_cast %75 : vector<1x64xf32> to vector<1x1x64xf32>
    %77 = vector.broadcast %76 : vector<1x1x64xf32> to vector<16x16x64xf32>
    %78 = arith.mulf %74, %77 : vector<16x16x64xf32>
    %79 = arith.addf %73, %78 : vector<16x16x64xf32>
    %c0_27 = arith.constant 0 : index
    %c0_28 = arith.constant 0 : index
    %80 = vector.load %arg5[%c0_27, %c0_28] : memref<1x64xf32, #tpu.memory_space<vmem>>, vector<1x64xf32>
    %81 = vector.shape_cast %80 : vector<1x64xf32> to vector<1x1x64xf32>
    %82 = vector.broadcast %81 : vector<1x1x64xf32> to vector<16x16x64xf32>
    %83 = arith.addf %79, %82 : vector<16x16x64xf32>
    %cst_29 = arith.constant 3.000000e+00 : f32
    %84 = vector.broadcast %cst_29 : f32 to vector<16x16x64xf32>
    %85 = arith.addf %83, %84 : vector<16x16x64xf32>
    %cst_30 = arith.constant 0.000000e+00 : f32
    %cst_31 = arith.constant 6.000000e+00 : f32
    %86 = vector.broadcast %cst_30 : f32 to vector<16x16x64xf32>
    %87 = arith.maximumf %86, %85 : vector<16x16x64xf32>
    %88 = vector.broadcast %cst_31 : f32 to vector<16x16x64xf32>
    %89 = arith.minimumf %88, %87 : vector<16x16x64xf32>
    %90 = arith.mulf %83, %89 : vector<16x16x64xf32>
    %cst_32 = arith.constant 0.166666672 : f32
    %91 = vector.broadcast %cst_32 : f32 to vector<16x16x64xf32>
    %92 = arith.mulf %90, %91 : vector<16x16x64xf32>
    %cst_33 = arith.constant dense<0.000000e+00> : vector<64xf32>
    %93 = vector.multi_reduction <add>, %92, %cst_33 [0, 1] : vector<16x16x64xf32> to vector<64xf32>
    %cst_34 = arith.constant 2.560000e+02 : f32
    %94 = vector.broadcast %cst_34 : f32 to vector<64xf32>
    %95 = arith.divf %93, %94 : vector<64xf32>
    %96 = vector.shape_cast %95 : vector<64xf32> to vector<1x64xf32>
    %c0_35 = arith.constant 0 : index
    %c0_36 = arith.constant 0 : index
    %97 = vector.load %arg6[%c0_35, %c0_36] : memref<64x16xf32, #tpu.memory_space<vmem>>, vector<64x16xf32>
    %cst_37 = arith.constant dense<0.000000e+00> : vector<1x16xf32>
    %98 = tpu.matmul %96, %97, %cst_37 {dimension_numbers = #tpu.dot_dimension_numbers<[1], [0], [0], [1], [0, 0, 1, 1], [], []>} : vector<1x64xf32>, vector<64x16xf32>, vector<1x16xf32> -> vector<1x16xf32>
    %c0_38 = arith.constant 0 : index
    %c0_39 = arith.constant 0 : index
    %99 = vector.load %arg7[%c0_38, %c0_39] : memref<1x16xf32, #tpu.memory_space<vmem>>, vector<1x16xf32>
    %100 = arith.addf %98, %99 : vector<1x16xf32>
    %cst_40 = arith.constant 0.000000e+00 : f32
    %101 = vector.broadcast %cst_40 : f32 to vector<1x16xf32>
    %102 = arith.maximumf %100, %101 : vector<1x16xf32>
    %c0_41 = arith.constant 0 : index
    %c0_42 = arith.constant 0 : index
    %103 = vector.load %arg8[%c0_41, %c0_42] : memref<16x64xf32, #tpu.memory_space<vmem>>, vector<16x64xf32>
    %cst_43 = arith.constant dense<0.000000e+00> : vector<1x64xf32>
    %104 = tpu.matmul %102, %103, %cst_43 {dimension_numbers = #tpu.dot_dimension_numbers<[1], [0], [0], [1], [0, 0, 1, 1], [], []>} : vector<1x16xf32>, vector<16x64xf32>, vector<1x64xf32> -> vector<1x64xf32>
    %c0_44 = arith.constant 0 : index
    %c0_45 = arith.constant 0 : index
    %105 = vector.load %arg9[%c0_44, %c0_45] : memref<1x64xf32, #tpu.memory_space<vmem>>, vector<1x64xf32>
    %106 = arith.addf %104, %105 : vector<1x64xf32>
    %cst_46 = arith.constant 3.000000e+00 : f32
    %107 = vector.broadcast %cst_46 : f32 to vector<1x64xf32>
    %108 = arith.addf %106, %107 : vector<1x64xf32>
    %cst_47 = arith.constant 0.000000e+00 : f32
    %cst_48 = arith.constant 6.000000e+00 : f32
    %109 = vector.broadcast %cst_47 : f32 to vector<1x64xf32>
    %110 = arith.maximumf %109, %108 : vector<1x64xf32>
    %111 = vector.broadcast %cst_48 : f32 to vector<1x64xf32>
    %112 = arith.minimumf %111, %110 : vector<1x64xf32>
    %cst_49 = arith.constant 0.166666672 : f32
    %113 = vector.broadcast %cst_49 : f32 to vector<1x64xf32>
    %114 = arith.mulf %112, %113 : vector<1x64xf32>
    %115 = vector.shape_cast %92 : vector<16x16x64xf32> to vector<256x64xf32>
    %116 = vector.broadcast %114 : vector<1x64xf32> to vector<256x64xf32>
    %117 = arith.mulf %115, %116 : vector<256x64xf32>
    %c0_50 = arith.constant 0 : index
    %c0_51 = arith.constant 0 : index
    %118 = vector.load %arg10[%c0_50, %c0_51] : memref<16x64xf32, #tpu.memory_space<vmem>>, vector<16x64xf32>
    %cst_52 = arith.constant dense<0.000000e+00> : vector<16x256xf32>
    %119 = tpu.matmul %118, %117, %cst_52 {dimension_numbers = #tpu.dot_dimension_numbers<[1], [1], [0], [0], [0, 0, 1, 0], [], []>} : vector<16x64xf32>, vector<256x64xf32>, vector<16x256xf32> -> vector<16x256xf32>
    %c0_53 = arith.constant 0 : index
    %c0_54 = arith.constant 0 : index
    %120 = vector.load %arg11[%c0_53, %c0_54] : memref<16x1xf32, #tpu.memory_space<vmem>>, vector<16x1xf32>
    %121 = vector.broadcast %120 : vector<16x1xf32> to vector<16x256xf32>
    %122 = arith.addf %119, %121 : vector<16x256xf32>
    %123 = arith.addf %122, %1 : vector<16x256xf32>
    %c0_55 = arith.constant 0 : index
    %c0_56 = arith.constant 0 : index
    %c0_57 = arith.constant 0 : index
    %124 = vector.load %arg12[%c0_55, %c0_56, %c0_57] : memref<1x16x256xf32, #tpu.memory_space<vmem>>, vector<1x16x256xf32>
    %125 = vector.shape_cast %124 : vector<1x16x256xf32> to vector<16x256xf32>
    %126 = vector.shape_cast %123 : vector<16x256xf32> to vector<1x16x256xf32>
    tpu.vector_store %arg12[%c0_55, %c0_56, %c0_57], %126 {strides = array<i32>} : memref<1x16x256xf32, #tpu.memory_space<vmem>>, vector<1x16x256xf32>,
    return
  }
  func.func @transform_0(%arg0: i32) -> (i32, i32, i32) {
    %c0_i32 = arith.constant 0 : i32
    %c0_i32_0 = arith.constant 0 : i32
    %c0_i32_1 = arith.constant 0 : i32
    return %arg0, %c0_i32, %c0_i32_0 : i32, i32, i32
  }
  func.func @transform_1(%arg0: i32) -> (i32, i32) {
    %c0_i32 = arith.constant 0 : i32
    %c0_i32_0 = arith.constant 0 : i32
    %c0_i32_1 = arith.constant 0 : i32
    return %c0_i32, %c0_i32_0 : i32, i32
  }
  func.func @transform_2(%arg0: i32) -> (i32, i32) {
    %c0_i32 = arith.constant 0 : i32
    %c0_i32_0 = arith.constant 0 : i32
    %c0_i32_1 = arith.constant 0 : i32
    return %c0_i32, %c0_i32_0 : i32, i32
  }
  func.func @transform_3(%arg0: i32) -> (i32, i32) {
    %c0_i32 = arith.constant 0 : i32
    %c0_i32_0 = arith.constant 0 : i32
    %c0_i32_1 = arith.constant 0 : i32
    return %c0_i32, %c0_i32_0 : i32, i32
  }
  func.func @transform_4(%arg0: i32) -> (i32, i32) {
    %c0_i32 = arith.constant 0 : i32
    %c0_i32_0 = arith.constant 0 : i32
    %c0_i32_1 = arith.constant 0 : i32
    return %c0_i32, %c0_i32_0 : i32, i32
  }
  func.func @transform_5(%arg0: i32) -> (i32, i32) {
    %c0_i32 = arith.constant 0 : i32
    %c0_i32_0 = arith.constant 0 : i32
    %c0_i32_1 = arith.constant 0 : i32
    return %c0_i32, %c0_i32_0 : i32, i32
  }
  func.func @transform_6(%arg0: i32) -> (i32, i32) {
    %c0_i32 = arith.constant 0 : i32
    %c0_i32_0 = arith.constant 0 : i32
    %c0_i32_1 = arith.constant 0 : i32
    return %c0_i32, %c0_i32_0 : i32, i32
  }
  func.func @transform_7(%arg0: i32) -> (i32, i32) {
    %c0_i32 = arith.constant 0 : i32
    %c0_i32_0 = arith.constant 0 : i32
    %c0_i32_1 = arith.constant 0 : i32
    return %c0_i32, %c0_i32_0 : i32, i32
  }
  func.func @transform_8(%arg0: i32) -> (i32, i32) {
    %c0_i32 = arith.constant 0 : i32
    %c0_i32_0 = arith.constant 0 : i32
    %c0_i32_1 = arith.constant 0 : i32
    return %c0_i32, %c0_i32_0 : i32, i32
  }
  func.func @transform_9(%arg0: i32) -> (i32, i32) {
    %c0_i32 = arith.constant 0 : i32
    %c0_i32_0 = arith.constant 0 : i32
    %c0_i32_1 = arith.constant 0 : i32
    return %c0_i32, %c0_i32_0 : i32, i32
  }
  func.func @transform_10(%arg0: i32) -> (i32, i32) {
    %c0_i32 = arith.constant 0 : i32
    %c0_i32_0 = arith.constant 0 : i32
    %c0_i32_1 = arith.constant 0 : i32
    return %c0_i32, %c0_i32_0 : i32, i32
  }
  func.func @transform_11(%arg0: i32) -> (i32, i32, i32) {
    %c0_i32 = arith.constant 0 : i32
    %c0_i32_0 = arith.constant 0 : i32
    %c0_i32_1 = arith.constant 0 : i32
    return %arg0, %c0_i32, %c0_i32_0 : i32, i32, i32
  }
}

</mosaic_0001>

<bundles_post_ra>
// kernel: tpu_custom_call.1
= control target key start
LH: loop header
LB: loop body
LE: loop exit
PB: predicated region body
PF: predicated region fallthrough
CT: control target
= control target key end

     0   :  { %s4932_s0 = inlined_call_operand.vmem [shape: f32[2,16,256], index: 0, kind: input, shape index: {}]   ;;  %s4933_s1 = inlined_call_operand.vmem [shape: f32[16,64], index: 1, kind: input, shape index: {}]   ;;  %s4934_s2 = inlined_call_operand.vmem [shape: f32[1,64], index: 2, kind: input, shape index: {}]   ;;  %s4935_s3 = inlined_call_operand.vmem [shape: f32[9,64], index: 3, kind: input, shape index: {}]   ;;  %s4936_s4 = inlined_call_operand.hbm [shape: f32[1,64], index: 4, kind: input, shape index: {}]   ;;  %s4937_s5 = inlined_call_operand.vmem [shape: f32[64,16], index: 5, kind: input, shape index: {}]   ;;  %s4938_s6 = inlined_call_operand.hbm [shape: f32[1,16], index: 6, kind: input, shape index: {}]   ;;  %s4939_s7 = inlined_call_operand.hbm [shape: f32[16,64], index: 7, kind: input, shape index: {}]   ;;  %s4940_s8 = inlined_call_operand.hbm [shape: f32[1,64], index: 8, kind: input, shape index: {}]   ;;  %s4941_s9 = inlined_call_operand.vmem [shape: f32[16,64], index: 9, kind: input, shape index: {}]   ;;  %s4942_s10 = inlined_call_operand.vmem [shape: f32[16,1], index: 10, kind: input, shape index: {}]   ;;  %s4943_s11 = inlined_call_operand.hbm [shape: f32[2,16,256], index: 11, kind: output, shape index: {}]  }
   0x1   :  { %4970 = sst [smem:[#allocation60_spill]] %s4936_s4 }
   0x2   :  { %16 = vsyncpa [#allocation4], 0 }
   0x3   :  { %17 = vsyncpa [#allocation7], 0 }
   0x4   :  { %18 = vsyncpa [#allocation10], 0 }
   0x5   :  { %19 = vsyncpa [#allocation5], 0 }
   0x6   :  { %21 = vsyncpa [#allocation5 + $0x1], 0  ;;  %s3194_s17 = smov 0   ;;  %s3196_s18 = smov 0  }
   0x7   :  { %s3198_s19 = smov 0   ;;  %s3200_s20 = smov 0  }
   0x8 LB: > { %s3215_s21 = sadd.s32 4294967295, %s3120_s20   ;;  %s2595_s22 = sadd.s32 4294967294, %s3120_s20   ;;  %s3120_s20 = sphi %s3200_s20, %s5086_s20   ;;  %s3116_s19 = sphi %s3198_s19, %s5085_s19   ;;  %s3112_s18 = sphi %s3196_s18, %s5084_s18   ;;  %s3108_s17 = sphi %s3194_s17, %s5083_s17  }
   0x9   : > { %s3219_s23 = sadd.s32 1, %s3120_s20   ;;  %s270_s24 = sadd.s32 1, %s3116_s19 }
   0xa   : > { %s267_s25 = ssub.s32 %s3120_s20, %s3219_s23  ;;  %p280_p0 = scmp.ne.s32.totalorder %s3116_s19, %s3112_s18 }
   0xb   : > { %p268_p1 = scmp.eq.s32.totalorder %s267_s25, 0  ;;  %p281_p2 = scmp.eq.s32.totalorder %s3215_s21, 1 }
   0xc   : > { %p286_p3 = scmp.ne.s32.totalorder %s3112_s18, %s3108_s17  ;;  %p287_p4 = scmp.eq.s32.totalorder %s2595_s22, 1 }
   0xd   : > { %s3230_s26 = scalar_select %p268_p1, %s3116_s19, %s270_s24  }
   0xe   : > { %p3232_p5 = por %p281_p2, %p280_p0  ;;  %p3236_p6 = por %p287_p4, %p286_p3 }
   0xf   : > { %4971 = sst [smem:[#allocation16_spill]] %s3230_s26  ;;  %p2596_p7 = scmp.ge.s32.totalorder %s3120_s20, 1 }
  0x10   : > { %s4972_s27 = scalar_select %p3232_p5, 1, 0 }
  0x11   : > { %s4973_s28 = scalar_select %p3236_p6, 1, 0 }
  0x12   : > { %p294_p8 = scmp.lt.s32.totalorder %s3120_s20, 3  ;;  %p4944_p9 = scmp.eq.s32.totalorder %s3215_s21, 0 }
  0x13   : > { %s3122_s30 = smov [#allocation6]   ;;  %s3123_s13 = smov [#allocation3]  }
  0x14   : > { %p3243_p10 = pnand %p2596_p7, %p294_p8  ;;  %s330_s12 = sshll.u32 %s3122_s30, 4  ;;  %s331_s12 = int_to_ptr.vmem [resolvable:$true] %s330_s12 }
  0x15   : > { %s316_s14 = sshll.u32 %s3123_s13, 4  ;;  %s3124_s16 = smov [#allocation8]   ;;  %s317_s14 = int_to_ptr.vmem [resolvable:$true] %s316_s14 }
  0x16   : > { %p2866_p11 = pneg %p3243_p10  ;;  %s340_s22 = sshll.u32 %s3124_s16, 4  ;;  %s3255_s22 = int_to_ptr.vmem [resolvable:$true] %s340_s22 }
  0x17   : > { %s2955_s24 = scalar_lea.vmem %s331_s12, 16  ;;  %s2962_s25 = scalar_lea.vmem %s331_s12, 32 }
  0x18   : > { %p3251_p12 = pnand %p4944_p9, %p2866_p11  ;;  %p2956_p0 = scmp.ne.s32.totalorder %s331_s12, %s2955_s24 }
  0x19   : > { %p2963_p3 = scmp.lt.s32.totalorder %s331_s12, %s331_s12  ;;  %p2964_p4 = scmp.lt.s32.totalorder %s2962_s25, %s2955_s24 }
  0x1a   : > { %p2946_p13 = pneg %p3251_p12 }
  0x1b   : > { %p2965_p7 = por %p2964_p4, %p2963_p3 }
  0x1c   : > { %p2958_p1 = pnand %p2956_p0, %p2946_p13 }
  0x1e   : > { %p2959_p2 = pneg %p2958_p1 }
  0x20   : > { %p2966_p8 = pnand %p2965_p7, %p2959_p2 }
  0x22   : > { %2969 = shalt.err (!%p2966_p8)
}
  0x23   : > { %2872 = dma.hbm_to_vmem [thread:$0]  (!%p3251_p12), %s4938_s6, 16, %s331_s12, [#allocation7]  }
  0x24   : > { %s2981_s16 = scalar_lea.vmem %s317_s14, 16  ;;  %s2988_s26 = scalar_lea.vmem %s317_s14, 32 }
  0x25   : > { %p2982_p11 = scmp.ne.s32.totalorder %s317_s14, %s2981_s16  ;;  %p2989_p1 = scmp.lt.s32.totalorder %s317_s14, %s317_s14 }
  0x26   : > { %p2990_p6 = scmp.lt.s32.totalorder %s2988_s26, %s2981_s16 }
  0x27   : > { %p2984_p9 = pnand %p2982_p11, %p2946_p13 }
  0x28   : > { %p2991_p5 = por %p2990_p6, %p2989_p1 }
  0x29   : > { %p2985_p0 = pneg %p2984_p9 }
  0x2b   : > { %p2992_p3 = pnand %p2991_p5, %p2985_p0 }
  0x2d   : > { %2995 = shalt.err (!%p2992_p3)
}
  0x2e   : > { %s4976_s4 = sld [smem:[#allocation60_spill]]  ;;  %s3007_s12 = scalar_lea.vmem %s3255_s22, 256 }
  0x2f   : > { %p3008_p2 = scmp.ne.s32.totalorder %s3255_s22, %s3007_s12  ;;  %p3015_p6 = scmp.lt.s32.totalorder %s3255_s22, %s3255_s22 }
  0x30   : > { %p3016_p5 = scmp.lt.s32.totalorder %s3007_s12, %s3007_s12 }
  0x31   : > { %p3010_p9 = pnand %p3008_p2, %p2946_p13 }
  0x32   : > { %p3017_p7 = por %p3016_p5, %p3015_p6 }
  0x33   : > { %p3011_p4 = pneg %p3010_p9 }
  0x34   : > { %2869 = dma.hbm_to_vmem [thread:$0]  (!%p3251_p12), %s4976_s4, 16, %s317_s14, [#allocation4]  }
  0x35   : > { %p3018_p8 = pnand %p3017_p7, %p3011_p4 }
  0x37   : > { %3021 = shalt.err (!%p3018_p8)
}
  0x38   : > { %s3125_s26 = smov 128   ;;  %s3126_s30 = smov 8  }
  0x39   : > { %2875 = dma.hbm_to_vmem [thread:$0]  (!%p3251_p12), %s4939_s7, 256, %s3255_s22, [#allocation7], %s3125_s26, %s3125_s26, %s3126_s30  }
  0x3a   : > { %s3127_s16 = smov [#allocation9]  }
  0x3b   : > { %s354_s24 = sshll.u32 %s3127_s16, 4  ;;  %s355_s24 = int_to_ptr.vmem [resolvable:$true] %s354_s24 }
  0x3c   : > { %s3033_s25 = scalar_lea.vmem %s355_s24, 16  ;;  %s3040_s12 = scalar_lea.vmem %s355_s24, 32 }
  0x3d   : > { %p3034_p11 = scmp.ne.s32.totalorder %s355_s24, %s3033_s25  ;;  %p3041_p3 = scmp.lt.s32.totalorder %s355_s24, %s355_s24 }
  0x3e   : > { %p3042_p2 = scmp.lt.s32.totalorder %s3040_s12, %s3033_s25 }
  0x3f   : > { %p3036_p0 = pnand %p3034_p11, %p2946_p13 }
  0x40   : > { %p3043_p9 = por %p3042_p2, %p3041_p3 }
  0x41   : > { %p3037_p1 = pneg %p3036_p0 }
  0x43   : > { %p3044_p4 = pnand %p3043_p9, %p3037_p1 }
  0x45   : > { %3047 = shalt.err (!%p3044_p4)
}
  0x46   : > { %2878 = dma.hbm_to_vmem [thread:$0]  (!%p3251_p12), %s4940_s8, 16, %s355_s24, [#allocation10]  }
  0x47   : > { %381 = sbr.rel (%p3243_p10) target bundleno = 1394 (0x572), region = 64 }
  0x4c   : > { %p4977_p6 = scmp.eq.s32.totalorder %s3215_s21, 0 }
  0x4e   : > { %3091 = dma.done.wait (%p4977_p6), [#allocation4], 16   ;;  %p4978_p13 = pmov %p4977_p6 }
  0x4f   : > { %p4979_p5 = pmov %p4977_p6 }
  0x50   : > { %3093 = vsyncadd (%p4978_p13), [#allocation4], 4294967280 }
  0x51   : > { %3095 = dma.done.wait (%p4979_p5), [#allocation7], 272   ;;  %p4980_p7 = pmov %p4979_p5 }
  0x52   : > { %p4981_p8 = pmov %p4979_p5 }
  0x53   : > { %3097 = vsyncadd (%p4980_p7), [#allocation7], 4294967024 }
  0x54   : > { %3099 = dma.done.wait (%p4981_p8), [#allocation10], 16   ;;  %p4982_p12 = pmov %p4979_p5 }
  0x55   : > { %p433_p10 = scmp.lt.s32.totalorder %s3215_s21, 1  ;;  %v507_v2 = vld [vmem:[%s4933_s1 + $0x8] sm:$0xff]  ;;  %v506_v3 = vld [vmem:[%s4933_s1] sm:$0xff]  ;;  %v4947_v6 = vmov 0.0   ;;  %vm515_vm0 = vcmask 130048   ;;  %vm997_vm1 = vcmask 523264  }
  0x56   : > { %3101 = vsyncadd (%p4982_p12), [#allocation10], 4294967280  ;;  %2770 = vmatprep.subr.mxu0 %v507_v2  ;;  %2822 = vmatprep.subr.mxu1 %v4947_v6  ;;  %vm1000_vm2 = vcmask 517120   ;;  %1003 = vst.msk [vmem:[#allocation2 + $0x20] sm:$0xff] %vm997_vm1, %v4947_v6  ;;  %v3480_v39 = vld [vmem:[%s4934_s2] ss:$0 sm:$0xff] }
  0x57   : > { %s434_s4 = scalar_select %p433_p10, %s3215_s21, 1  ;;  %2771 = vmatpush3.msra.mxu0 %v507_v2  ;;  %1004 = vst.msk [vmem:[#allocation2 + $0x28] sm:$0x3] %vm1000_vm2, %v4947_v6  ;;  %1001 = vst.msk [vmem:[#allocation2 + $0x10] sm:$0x3] %vm1000_vm2, %v4947_v6  ;;  %vm3129_vm3 = vmmov 0  }
  0x58   : > { %2772 = vmatprep.subr.mxu0 %v506_v3  ;;  %998 = vst.msk [vmem:[#allocation2] sm:$0xff] %vm997_vm1, %v4947_v6  ;;  %999 = vst.msk [vmem:[#allocation2 + $0x8] sm:$0xff] %vm997_vm1, %v4947_v6  ;;  %s430_s12 = sand.u32 1, %s3112_s18   ;;  %s2687_s15 = sshll.u32 %s3215_s21, 9 }
  0x59   : > { %s2686_s29 = sshll.u32 %s434_s4, 5  ;;  %2773 = vmatpush3.msra.mxu0 %v506_v3  ;;  %1002 = vst.msk [vmem:[#allocation2 + $0x18] sm:$0xff] %vm997_vm1, %v4947_v6  ;;  %1005 = vst.msk [vmem:[#allocation2 + $0x30] sm:$0xff] %vm997_vm1, %v4947_v6  ;;  %s2607_s13 = sshll.u32 %s430_s12, 5 }
  0x5a   : > { %s3315_s26 = scalar_lea.vmem %s4932_s0, %s2686_s29  ;;  %1006 = vst.msk [vmem:[#allocation2 + $0x38] sm:$0xff] %vm997_vm1, %v4947_v6  ;;  %1008 = vst.msk [vmem:[#allocation2 + $0x48] sm:$0xff] %vm997_vm1, %v4947_v6  ;;  %s432_s4 = scalar_lea.vmem [#allocation11], %s2607_s13 }
  0x5b   : > { %v438_v0 = vld [vmem:[%s3315_s26] sm:$0xff]  ;;  %v439_v1 = vld [vmem:[%s3315_s26 + $0x8] sm:$0xff]  ;;  %v440_v4 = vld [vmem:[%s3315_s26 + $0x10] sm:$0xff]  ;;  %1007 = vst.msk [vmem:[#allocation2 + $0x40] sm:$0x3] %vm1000_vm2, %v4947_v6  ;;  %s2492_s29 = sshll.u32 %s432_s4, 4  ;;  %s4890_s14 = scalar_lea.hbm %s4943_s11, %s2687_s15  ;;  %s4884_s29 = int_to_ptr.vmem [resolvable:$true] %s2492_s29 }
  0x5c   : > { %442 = vxpose.xlu0.b32.start [1/2] (short) %v438_v0, 128  ;;  %474 = vxpose.xlu1.b32.start [1/2] (short) %v439_v1, 128  ;;  %v441_v5 = vld [vmem:[%s3315_s26 + $0x18] sm:$0xff]  ;;  %1009 = vst.msk [vmem:[#allocation2 + $0x50] sm:$0xff] %vm997_vm1, %v4947_v6  ;;  %1011 = vst.msk [vmem:[#allocation2 + $0x60] sm:$0xff] %vm997_vm1, %v4947_v6  ;;  %s4892_s16 = scalar_lea.sflag [#allocation5], %s430_s12  ;;  %s3048_s21 = scalar_lea.vmem %s4884_s29, 512 }
  0x5d   : > { %1010 = vst.msk [vmem:[#allocation2 + $0x58] sm:$0x3] %vm1000_vm2, %v4947_v6  ;;  %1013 = vst.msk [vmem:[#allocation2 + $0x70] sm:$0x3] %vm1000_vm2, %v4947_v6  ;;  %p3049_p11 = scmp.ne.s32.totalorder %s4884_s29, %s3048_s21  ;;  %p5080_p0 = scmp.ne.s32.totalorder %s4972_s27, 0 }
  0x5e   : > { %1012 = vst.msk [vmem:[#allocation2 + $0x68] sm:$0xff] %vm997_vm1, %v4947_v6  ;;  %1014 = vst.msk [vmem:[#allocation2 + $0x78] sm:$0xff] %vm997_vm1, %v4947_v6  ;;  %s3131_s24 = smov [#allocation11]  }
  0x5f   : > { %1015 = vst.msk [vmem:[#allocation2 + $0x80] sm:$0xff] %vm997_vm1, %v4947_v6  ;;  %1017 = vst.msk [vmem:[#allocation2 + $0x90] sm:$0xff] %vm997_vm1, %v4947_v6  ;;  %p3050_p1 = pnand %p3049_p11, %p5080_p0  ;;  %s3052_s25 = sshll.u32 %s3131_s24, 4  ;;  %s3053_s25 = int_to_ptr.vmem [resolvable:$false] %s3052_s25 }
  0x60   : > { %443 = vxpose.xlu0.b32.end [2/2] (short) %v440_v4, 128  ;;  %475 = vxpose.xlu1.b32.end [2/2] (short) %v441_v5, 128  ;;  %1016 = vst.msk [vmem:[#allocation2 + $0x88] sm:$0x3] %vm1000_vm2, %v4947_v6  ;;  %1019 = vst.msk [vmem:[#allocation2 + $0xa0] sm:$0x3] %vm1000_vm2, %v4947_v6  ;;  %s3054_s13 = scalar_lea.vmem %s3053_s25, 1024  ;;  %p3055_p2 = scmp.lt.s32.totalorder %s4884_s29, %s3053_s25 }
  0x61   : > { %1018 = vst.msk [vmem:[#allocation2 + $0x98] sm:$0xff] %vm997_vm1, %v4947_v6  ;;  %1020 = vst.msk [vmem:[#allocation2 + $0xa8] sm:$0xff] %vm997_vm1, %v4947_v6  ;;  %p3051_p3 = pneg %p3050_p1  ;;  %p3056_p9 = scmp.lt.s32.totalorder %s3054_s13, %s3048_s21 }
  0x62   : > { %1021 = vst.msk [vmem:[#allocation2 + $0xb0] sm:$0xff] %vm997_vm1, %v4947_v6  ;;  %1023 = vst.msk [vmem:[#allocation2 + $0xc0] sm:$0xff] %vm997_vm1, %v4947_v6 }
  0x63   : > { %1022 = vst.msk [vmem:[#allocation2 + $0xb8] sm:$0x3] %vm1000_vm2, %v4947_v6  ;;  %1025 = vst.msk [vmem:[#allocation2 + $0xd0] sm:$0x3] %vm1000_vm2, %v4947_v6  ;;  %p3057_p4 = por %p3056_p9, %p3055_p2 }
  0x64   : > { %1024 = vst.msk [vmem:[#allocation2 + $0xc8] sm:$0xff] %vm997_vm1, %v4947_v6  ;;  %1026 = vst.msk [vmem:[#allocation2 + $0xd8] sm:$0xff] %vm997_vm1, %v4947_v6 }
  0x65   : > { %1027 = vst.msk [vmem:[#allocation2 + $0xe0] sm:$0xff] %vm997_vm1, %v4947_v6  ;;  %1029 = vst.msk [vmem:[#allocation2 + $0xf0] sm:$0xff] %vm997_vm1, %v4947_v6  ;;  %p3058_p6 = pnand %p3057_p4, %p3051_p3 }
  0x66   : > { %1028 = vst.msk [vmem:[#allocation2 + $0xe8] sm:$0x3] %vm1000_vm2, %v4947_v6  ;;  %1031 = vst.msk [vmem:[#allocation2 + $0x100] sm:$0x3] %vm1000_vm2, %v4947_v6 }
  0x67   : > { %1030 = vst.msk [vmem:[#allocation2 + $0xf8] sm:$0xff] %vm997_vm1, %v4947_v6  ;;  %1032 = vst.msk [vmem:[#allocation2 + $0x108] sm:$0xff] %vm997_vm1, %v4947_v6 }
  0x68   : > { %1033 = vst.msk [vmem:[#allocation2 + $0x110] sm:$0xff] %vm997_vm1, %v4947_v6  ;;  %1035 = vst.msk [vmem:[#allocation2 + $0x120] sm:$0xff] %vm997_vm1, %v4947_v6 }
  0x69   : > { %1034 = vst.msk [vmem:[#allocation2 + $0x118] sm:$0x3] %vm1000_vm2, %v4947_v6  ;;  %1037 = vst.msk [vmem:[#allocation2 + $0x130] sm:$0x3] %vm1000_vm2, %v4947_v6 }
  0x6a   : > { %1036 = vst.msk [vmem:[#allocation2 + $0x128] sm:$0xff] %vm997_vm1, %v4947_v6  ;;  %1038 = vst.msk [vmem:[#allocation2 + $0x138] sm:$0xff] %vm997_vm1, %v4947_v6 }
  0x6b   : > { %1039 = vst.msk [vmem:[#allocation2 + $0x140] sm:$0xff] %vm997_vm1, %v4947_v6  ;;  %1041 = vst.msk [vmem:[#allocation2 + $0x150] sm:$0xff] %vm997_vm1, %v4947_v6 }
  0x6c   : > { %1040 = vst.msk [vmem:[#allocation2 + $0x148] sm:$0x3] %vm1000_vm2, %v4947_v6  ;;  %1043 = vst.msk [vmem:[#allocation2 + $0x160] sm:$0x3] %vm1000_vm2, %v4947_v6 }
  0x6d   : > { %1042 = vst.msk [vmem:[#allocation2 + $0x158] sm:$0xff] %vm997_vm1, %v4947_v6  ;;  %1044 = vst.msk [vmem:[#allocation2 + $0x168] sm:$0xff] %vm997_vm1, %v4947_v6 }
  0x6e   : > { %1045 = vst.msk [vmem:[#allocation2 + $0x170] sm:$0xff] %vm997_vm1, %v4947_v6  ;;  %1047 = vst.msk [vmem:[#allocation2 + $0x180] sm:$0xff] %vm997_vm1, %v4947_v6 }
  0x6f   : > { %1046 = vst.msk [vmem:[#allocation2 + $0x178] sm:$0x3] %vm1000_vm2, %v4947_v6  ;;  %1049 = vst.msk [vmem:[#allocation2 + $0x190] sm:$0x3] %vm1000_vm2, %v4947_v6 }
  0x70   : > { %1048 = vst.msk [vmem:[#allocation2 + $0x188] sm:$0xff] %vm997_vm1, %v4947_v6  ;;  %1050 = vst.msk [vmem:[#allocation2 + $0x198] sm:$0xff] %vm997_vm1, %v4947_v6 }
  0x71   : > { %1051 = vst.msk [vmem:[#allocation2 + $0x1a0] sm:$0xff] %vm997_vm1, %v4947_v6 }
  0x72   : > { %1052 = vst.msk [vmem:[#allocation2 + $0x1a8] sm:$0x3] %vm1000_vm2, %v4947_v6 }
  0xd8   : > { %v458_v7 = vpop.trf.xlu0  ;;  %v490_v8 = vpop.trf.xlu1 }
  0xd9   : > { %2774 = vmatprep.mubr.msk.f32.mxu0 %vm515_vm0, %v458_v7 }
  0xdc   : > { %v459_v9 = vpop.trf.xlu0  ;;  %v491_v10 = vpop.trf.xlu1 }
  0xdd   : > { %2775 = vmatmul.mubr.msk.f32.vlgmr.msra.gmra.mxu0 %vm515_vm0, %v459_v9 }
  0xe0   : > { %v460_v11 = vpop.trf.xlu0  ;;  %v492_v13 = vpop.trf.xlu1 }
  0xe1   : > { %2777 = vmatprep.mubr.msk.f32.mxu0 %vm515_vm0, %v460_v11 }
  0xe4   : > { %v461_v12 = vpop.trf.xlu0  ;;  %v493_v15 = vpop.trf.xlu1 }
  0xe5   : > { %2778 = vmatmul.mubr.msk.f32.gmra.mxu0 %vm515_vm0, %v461_v12 }
  0xe8   : > { %v462_v14 = vpop.trf.xlu0  ;;  %v494_v18 = vpop.trf.xlu1 }
  0xe9   : > { %2780 = vmatprep.mubr.msk.f32.mxu0 %vm515_vm0, %v462_v14 }
  0xec   : > { %v463_v16 = vpop.trf.xlu0  ;;  %v495_v20 = vpop.trf.xlu1 }
  0xed   : > { %2781 = vmatmul.mubr.msk.f32.gmra.mxu0 %vm515_vm0, %v463_v16 }
  0xf0   : > { %v464_v17 = vpop.trf.xlu0  ;;  %v496_v23 = vpop.trf.xlu1 }
  0xf1   : > { %2783 = vmatprep.mubr.msk.f32.mxu0 %vm515_vm0, %v464_v17 }
  0xf4   : > { %v465_v19 = vpop.trf.xlu0  ;;  %v497_v25 = vpop.trf.xlu1 }
  0xf5   : > { %2784 = vmatmul.mubr.msk.f32.gmra.mxu0 %vm515_vm0, %v465_v19 }
  0xf8   : > { %v466_v21 = vpop.trf.xlu0  ;;  %v498_v28 = vpop.trf.xlu1 }
  0xf9   : > { %2786 = vmatprep.mubr.msk.f32.mxu0 %vm515_vm0, %v466_v21 }
  0xfc   : > { %v467_v22 = vpop.trf.xlu0  ;;  %v499_v30 = vpop.trf.xlu1 }
  0xfd   : > { %2787 = vmatmul.mubr.msk.f32.gmra.mxu0 %vm515_vm0, %v467_v22 }
 0x100   : > { %v468_v24 = vpop.trf.xlu0  ;;  %v3343_v33 = vpop.trf.xlu1 }
 0x101   : > { %2789 = vmatprep.mubr.msk.f32.mxu0 %vm515_vm0, %v468_v24 }
 0x104   : > { %v469_v26 = vpop.trf.xlu0  ;;  %v3349_v34 = vpop.trf.xlu1 }
 0x105   : > { %2790 = vmatmul.mubr.msk.f32.gmra.mxu0 %vm515_vm0, %v469_v26 }
 0x108   : > { %v470_v27 = vpop.trf.xlu0  ;;  %v3353_v35 = vpop.trf.xlu1 }
 0x109   : > { %2792 = vmatprep.mubr.msk.f32.mxu0 %vm515_vm0, %v470_v27 }
 0x10c   : > { %v471_v29 = vpop.trf.xlu0  ;;  %v503_v36 = vpop.trf.xlu1 }
 0x10d   : > { %2793 = vmatmul.mubr.msk.f32.gmra.mxu0 %vm515_vm0, %v471_v29 }
 0x110   : > { %v472_v31 = vpop.trf.xlu0  ;;  %v504_v37 = vpop.trf.xlu1 }
 0x111   : > { %2795 = vmatprep.mubr.msk.f32.mxu0 %vm515_vm0, %v472_v31 }
 0x114   : > { %v473_v32 = vpop.trf.xlu0  ;;  %v505_v38 = vpop.trf.xlu1 }
 0x115   : > { %2796 = vmatmul.mubr.msk.f32.gmra.mxu0 %vm515_vm0, %v473_v32  ;;  %v3503_v32 = vld [vmem:[%s4935_s3] sm:$0xff] }
 0x116   : > { %2798 = vmatprep.mubr.msk.f32.mxu0 %vm515_vm0, %v490_v8 }
 0x119   : > { %2799 = vmatmul.mubr.msk.f32.gmra.mxu0 %vm515_vm0, %v491_v10 }
 0x11a   : > { %2801 = vmatprep.mubr.msk.f32.mxu0 %vm515_vm0, %v492_v13 }
 0x11d   : > { %2802 = vmatmul.mubr.msk.f32.gmra.mxu0 %vm515_vm0, %v493_v15 }
 0x11e   : > { %2804 = vmatprep.mubr.msk.f32.mxu0 %vm515_vm0, %v494_v18 }
 0x121   : > { %2805 = vmatmul.mubr.msk.f32.gmra.mxu0 %vm515_vm0, %v495_v20  ;;  %v1124_v20 = vlaneseq }
 0x122   : > { %2807 = vmatprep.mubr.msk.f32.mxu0 %vm515_vm0, %v496_v23 }
 0x125   : > { %2808 = vmatmul.mubr.msk.f32.gmra.mxu0 %vm515_vm0, %v497_v25  ;;  %v3495_v25 = vshrl.u32 %v1124_v20, 7 }
 0x126   : > { %2810 = vmatprep.mubr.msk.f32.mxu0 %vm515_vm0, %v498_v28 }
 0x127   : > { %4983 = vst [vmem:[#allocation17_spill] sm:$0xff] %v3495_v25  ;;  %v4946_v26 = vsub.s32 0, %v3495_v25  ;;  %v1194_v27 = vsub.s32 3, %v3495_v25  ;;  %v1262_v31 = vsub.s32 6, %v3495_v25 }
 0x129   : > { %2811 = vmatmul.mubr.msk.f32.gmra.mxu0 %vm515_vm0, %v499_v30 }
 0x12a   : > { %2813 = vmatprep.mubr.msk.f32.mxu0 %vm515_vm0, %v3343_v33 }
 0x12d   : > { %2814 = vmatmul.mubr.msk.f32.gmra.mxu0 %vm515_vm0, %v3349_v34 }
 0x12e   : > { %2816 = vmatprep.mubr.msk.f32.mxu0 %vm515_vm0, %v3353_v35 }
 0x131   : > { %2817 = vmatmul.mubr.msk.f32.gmra.mxu0 %vm515_vm0, %v503_v36  ;;  %v1088_v36 = vld [vmem:[#allocation2] sm:$0xff] }
 0x132   : > { %2819 = vmatprep.mubr.msk.f32.mxu0 %vm515_vm0, %v504_v37  ;;  %v3508_v37 = vrot.slane %v3503_v32, %v4946_v26 }
 0x135   : > { %2820 = vmatmul.mubr.msk.f32.gmra.mxu0 %vm515_vm0, %v505_v38  ;;  %v3511_v38 = vrot.slane %v3503_v32, %v1194_v27 }
 0x19d   : > { %v2776_v40 = vpop.f32.mrf.mxu0 }
 0x19e   : > { %v684_v41 = vadd.f32 %v2776_v40, %v3480_v39 }
 0x19f   : > { %v678_v42 = vpop.f32.mrf.mxu0 }
 0x1a0   : > { %v838_v43 = vadd.f32 3.0, %v684_v41  ;;  %v679_v44 = vadd.f32 %v3480_v39, %v678_v42 }
 0x1a2   : > { %v870_v45 = vmax.f32 %v838_v43, 0.0  ;;  %v837_v46 = vadd.f32 3.0, %v679_v44 }
 0x1a4   : > { %v902_v47 = vmin.f32 %v870_v45, 6.0  ;;  %v869_v48 = vmax.f32 %v837_v46, 0.0  ;;  %v1366_v45 = vsub.s32 1, %v3495_v25 }
 0x1a5   : > { %v2779_v49 = vpop.f32.mrf.mxu0 }
 0x1a6   : > { %v934_v50 = vmul.f32 %v902_v47, %v684_v41  ;;  %v901_v51 = vmin.f32 %v869_v48, 6.0  ;;  %v694_v52 = vadd.f32 %v2779_v49, %v3480_v39  ;;  %v1089_v41 = vld [vmem:[#allocation2 + $0x8] sm:$0xff] }
 0x1a7   : > { %v688_v53 = vpop.f32.mrf.mxu0 }
 0x1a8   : > { %v966_v54 = vmul.f32 0.16666667, %v934_v50  ;;  %v933_v55 = vmul.f32 %v901_v51, %v679_v44  ;;  %v840_v56 = vadd.f32 3.0, %v694_v52  ;;  %v689_v57 = vadd.f32 %v3480_v39, %v688_v53 }
 0x1a9   : > { %v3517_v44 = vrot.slane %v3503_v32, %v1262_v31  ;;  %v1128_v50 = vmul.f32 %v3508_v37, %v1088_v36  ;;  %v1129_v51 = vmul.f32 %v3508_v37, %v1089_v41 }
 0x1aa   : > { %1055 = vst.msk [vmem:[#allocation2 + $0x21] sm:$0xff] %vm997_vm1, %v966_v54  ;;  %v965_v58 = vmul.f32 0.16666667, %v933_v55  ;;  %v872_v59 = vmax.f32 %v840_v56, 0.0  ;;  %v839_v60 = vadd.f32 3.0, %v689_v57 }
 0x1ac   : > { %1054 = vst.msk [vmem:[#allocation2 + $0x19] sm:$0xff] %vm997_vm1, %v965_v58  ;;  %v904_v61 = vmin.f32 %v872_v59, 6.0  ;;  %v871_v62 = vmax.f32 %v839_v60, 0.0  ;;  %v1328_v58 = vld [vmem:[#allocation2 + $0x1] sm:$0xff]  ;;  %v3538_v60 = vrot.slane %v3503_v32, %v1366_v45 }
 0x1ad   : > { %v2782_v63 = vpop.f32.mrf.mxu0 }
 0x1ae   : > { %v936_v0 = vmul.f32 %v904_v61, %v694_v52  ;;  %v903_v1 = vmin.f32 %v871_v62, 6.0  ;;  %v704_v2 = vadd.f32 %v2782_v63, %v3480_v39  ;;  %v1329_v61 = vld [vmem:[#allocation2 + $0x9] sm:$0xff]  ;;  %v1434_v63 = vsub.s32 4, %v3495_v25 }
 0x1af   : > { %v698_v3 = vpop.f32.mrf.mxu0 }
 0x1b0   : > { %v968_v4 = vmul.f32 0.16666667, %v936_v0  ;;  %v935_v5 = vmul.f32 %v903_v1, %v689_v57  ;;  %v842_v7 = vadd.f32 3.0, %v704_v2  ;;  %v699_v8 = vadd.f32 %v3480_v39, %v698_v3 }
 0x1b1   : > { %v1368_v3 = vmul.f32 %v3538_v60, %v1328_v58 }
 0x1b2   : > { %1057 = vst.msk [vmem:[#allocation2 + $0x39] sm:$0xff] %vm997_vm1, %v968_v4  ;;  %v967_v9 = vmul.f32 0.16666667, %v935_v5  ;;  %v874_v10 = vmax.f32 %v842_v7, 0.0  ;;  %v841_v13 = vadd.f32 3.0, %v699_v8  ;;  %v2085_v5 = vld [vmem:[%s4937_s5 + $0x38] sm:$0xff] }
 0x1b3   : > { %v1090_v42 = vld [vmem:[#allocation2 + $0x18] sm:$0xff]  ;;  %v3513_v43 = vld [vmem:[#allocation2 + $0x20] sm:$0xff]  ;;  %v2084_v7 = vld [vmem:[%s4937_s5 + $0x30] sm:$0xff]  ;;  %2823 = vmatpush3.msra.mxu1 %v2085_v5 }
 0x1b4   : > { %1056 = vst.msk [vmem:[#allocation2 + $0x31] sm:$0xff] %vm997_vm1, %v967_v9  ;;  %v906_v12 = vmin.f32 %v874_v10, 6.0  ;;  %v873_v17 = vmax.f32 %v841_v13, 0.0  ;;  %v1196_v52 = vmul.f32 %v3511_v38, %v1090_v42  ;;  %v1197_v53 = vmul.f32 %v3511_v38, %v3513_v43  ;;  %2824 = vmatprep.subr.mxu1 %v4947_v6  ;;  %v2083_v13 = vld [vmem:[%s4937_s5 + $0x28] sm:$0xff] }
 0x1b5   : > { %v2785_v11 = vpop.f32.mrf.mxu0  ;;  %v1369_v10 = vmul.f32 %v3538_v60, %v1329_v61  ;;  %2825 = vmatpush3.msra.mxu1 %v2084_v7  ;;  %v1131_v45 = vmul.f32 %v3508_v37, %v3513_v43 }
 0x1b6   : > { %v714_v14 = vadd.f32 %v2785_v11, %v3480_v39  ;;  %v938_v16 = vmul.f32 %v906_v12, %v704_v2  ;;  %v905_v22 = vmin.f32 %v873_v17, 6.0  ;;  %v1228_v0 = vadd.f32 %v1196_v52, %v1128_v50  ;;  %2826 = vmatprep.subr.mxu1 %v4947_v6 }
 0x1b7   : > { %v708_v15 = vpop.f32.mrf.mxu0  ;;  %v1229_v1 = vadd.f32 %v1197_v53, %v1129_v51  ;;  %v1502_v2 = vsub.s32 7, %v3495_v25  ;;  %v1606_v17 = vsub.s32 2, %v3495_v25  ;;  %2827 = vmatpush3.msra.mxu1 %v2083_v13  ;;  %v2080_v51 = vld [vmem:[%s4937_s5 + $0x10] sm:$0xff] }
 0x1b8   : > { %v844_v18 = vadd.f32 3.0, %v714_v14  ;;  %v709_v19 = vadd.f32 %v3480_v39, %v708_v15  ;;  %v970_v21 = vmul.f32 0.16666667, %v938_v16  ;;  %v937_v28 = vmul.f32 %v905_v22, %v699_v8  ;;  %v3565_v16 = vld [vmem:[#allocation2 + $0x21] sm:$0xff]  ;;  %2828 = vmatprep.subr.mxu1 %v4947_v6 }
 0x1b9   : > { %v3575_v22 = vrot.slane %v3503_v32, %v1502_v2  ;;  %v3611_v43 = vrot.slane %v3503_v32, %v1606_v17 }
 0x1ba   : > { %1059 = vst.msk [vmem:[#allocation2 + $0x51] sm:$0xff] %vm997_vm1, %v970_v21  ;;  %v876_v23 = vmax.f32 %v844_v18, 0.0  ;;  %v843_v24 = vadd.f32 3.0, %v709_v19  ;;  %v969_v33 = vmul.f32 0.16666667, %v937_v28  ;;  %v1330_v18 = vld [vmem:[#allocation2 + $0x19] sm:$0xff]  ;;  %v1130_v28 = vmul.f32 %v3508_v37, %v1090_v42 }
 0x1bb   : > { %v3520_v46 = vld [vmem:[#allocation2 + $0x30] sm:$0xff]  ;;  %v3522_v47 = vld [vmem:[#allocation2 + $0x38] sm:$0xff]  ;;  %v2082_v21 = vld [vmem:[%s4937_s5 + $0x20] sm:$0xff]  ;;  %v1674_v42 = vsub.s32 5, %v3495_v25  ;;  %4984 = vst [vmem:[#allocation18_spill] sm:$0xff] %v3611_v43  ;;  %v1370_v5 = vmul.f32 %v3538_v60, %v1330_v18 }
 0x1bc   : > { %v908_v29 = vmin.f32 %v876_v23, 6.0  ;;  %v875_v30 = vmax.f32 %v843_v24, 0.0  ;;  %1058 = vst.msk [vmem:[#allocation2 + $0x49] sm:$0xff] %vm997_vm1, %v969_v33  ;;  %v1264_v56 = vmul.f32 %v3517_v44, %v3520_v46  ;;  %v1265_v57 = vmul.f32 %v3517_v44, %v3522_v47  ;;  %2829 = vmatpush3.msra.mxu1 %v2082_v21  ;;  %v3602_v50 = vld [vmem:[#allocation2 + $0x31] sm:$0xff] }
 0x1bd   : > { %v2788_v40 = vpop.f32.mrf.mxu0  ;;  %2830 = vmatprep.subr.mxu1 %v4947_v6  ;;  %v3636_v21 = vrot.slane %v3503_v32, %v1674_v42 }
 0x1be   : > { %v940_v34 = vmul.f32 %v908_v29, %v714_v14  ;;  %v907_v35 = vmin.f32 %v875_v30, 6.0  ;;  %v3535_v59 = vadd.f32 %v2788_v40, %v3480_v39  ;;  %v1296_v8 = vadd.f32 %v1264_v56, %v1228_v0  ;;  %v2079_v0 = vld [vmem:[%s4937_s5 + $0x8] sm:$0xff] }
 0x1bf   : > { %v718_v54 = vpop.f32.mrf.mxu0  ;;  %v1297_v9 = vadd.f32 %v1265_v57, %v1229_v1  ;;  %v3561_v14 = vrot.slane %v3503_v32, %v1434_v63  ;;  %v1199_v40 = vmul.f32 %v3511_v38, %v3522_v47  ;;  %4985 = vst [vmem:[#allocation19_spill] sm:$0xff] %v3636_v21 }
 0x1c0   : > { %v972_v48 = vmul.f32 0.16666667, %v940_v34  ;;  %v939_v49 = vmul.f32 %v907_v35, %v709_v19  ;;  %v3542_v62 = vadd.f32 %v3480_v39, %v718_v54  ;;  %v846_v11 = vadd.f32 3.0, %v3535_v59  ;;  %v2081_v34 = vld [vmem:[%s4937_s5 + $0x18] sm:$0xff]  ;;  %v1568_v54 = vld [vmem:[#allocation2 + $0x2] sm:$0xff] }
 0x1c1   : > { %v1198_v19 = vmul.f32 %v3511_v38, %v3520_v46  ;;  %v1400_v23 = vadd.f32 %v1368_v3, %v1296_v8  ;;  %v1401_v24 = vadd.f32 %v1369_v10, %v1297_v9  ;;  %v1437_v35 = vmul.f32 %v3561_v14, %v3565_v16  ;;  %2831 = vmatpush3.msra.mxu1 %v2081_v34  ;;  %v2078_v9 = vld [vmem:[%s4937_s5] sm:$0xff] }
 0x1c2   : > { %1061 = vst.msk [vmem:[#allocation2 + $0x69] sm:$0xff] %vm997_vm1, %v972_v48  ;;  %v971_v55 = vmul.f32 0.16666667, %v939_v49  ;;  %v845_v12 = vadd.f32 3.0, %v3542_v62  ;;  %v878_v27 = vmax.f32 %v846_v11, 0.0  ;;  %v1436_v36 = vmul.f32 %v3561_v14, %v1330_v18  ;;  %v3600_v48 = vld [vmem:[#allocation2 + $0x39] sm:$0xff]  ;;  %2832 = vmatprep.subr.mxu1 %v4947_v6 }
 0x1c3   : > { %v3563_v15 = vld [vmem:[#allocation2 + $0x48] sm:$0xff]  ;;  %v3578_v29 = vld [vmem:[#allocation2 + $0x50] sm:$0xff]  ;;  %v1230_v49 = vadd.f32 %v1198_v19, %v1130_v28  ;;  %v1469_v53 = vadd.f32 %v1437_v35, %v1401_v24  ;;  %v1505_v1 = vmul.f32 %v3575_v22, %v3600_v48  ;;  %v1231_v2 = vadd.f32 %v1199_v40, %v1131_v45  ;;  %2833 = vmatpush3.msra.mxu1 %v2080_v51  ;;  %v1570_v28 = vld [vmem:[#allocation2 + $0x1a] sm:$0xff] }
 0x1c4   : > { %1060 = vst.msk [vmem:[#allocation2 + $0x61] sm:$0xff] %vm997_vm1, %v971_v55  ;;  %v1266_v30 = vmul.f32 %v3517_v44, %v3563_v15  ;;  %v877_v31 = vmax.f32 %v845_v12, 0.0  ;;  %v1468_v52 = vadd.f32 %v1436_v36, %v1400_v23  ;;  %v1569_v55 = vld [vmem:[#allocation2 + $0xa] sm:$0xff]  ;;  %v1267_v56 = vmul.f32 %v3517_v44, %v3578_v29  ;;  %2834 = vmatprep.subr.mxu1 %v4947_v6  ;;  %v3656_v51 = vld [vmem:[%s4935_s3 + $0x8] ss:$0 sm:$0xff] }
 0x1c5   : > { %v2791_v4 = vpop.f32.mrf.mxu0  ;;  %v910_v57 = vmin.f32 %v878_v27, 6.0  ;;  %v1504_v3 = vmul.f32 %v3575_v22, %v3602_v50  ;;  %v1608_v7 = vmul.f32 %v3611_v43, %v1568_v54  ;;  %v1609_v8 = vmul.f32 %v3611_v43, %v1569_v55  ;;  %2835 = vmatpush3.msra.mxu1 %v2079_v0  ;;  %v1571_v27 = vld [vmem:[#allocation2 + $0x22] sm:$0xff]  ;;  %v1573_v54 = vld [vmem:[#allocation2 + $0x3a] sm:$0xff]  ;;  %v1572_v55 = vld [vmem:[#allocation2 + $0x32] sm:$0xff] }
 0x1c6   : > { %v3583_v33 = vadd.f32 %v2791_v4, %v3480_v39  ;;  %v1298_v58 = vadd.f32 %v1266_v30, %v1230_v49  ;;  %v909_v61 = vmin.f32 %v877_v31, 6.0  ;;  %v1537_v11 = vadd.f32 %v1505_v1, %v1469_v53  ;;  %2836 = vmatprep.subr.mxu1 %v4947_v6  ;;  %v3647_v31 = vld [vmem:[#allocation2 + $0x49] sm:$0xff] }
 0x1c7   : > { %v728_v20 = vpop.f32.mrf.mxu0  ;;  %v1536_v10 = vadd.f32 %v1504_v3, %v1468_v52  ;;  %v1299_v12 = vadd.f32 %v1267_v56, %v1231_v2  ;;  %v942_v13 = vmul.f32 %v910_v57, %v3535_v59  ;;  %2837 = vmatpush3.msra.mxu1 %v2078_v9  ;;  %v1132_v59 = vmul.f32 %v3508_v37, %v3520_v46  ;;  %v3661_v56 = vld [vmem:[#allocation2 + $0x51] sm:$0xff] }
 0x1c8   : > { %v3595_v41 = vadd.f32 %v3480_v39, %v728_v20  ;;  %v848_v63 = vadd.f32 3.0, %v3583_v33  ;;  %v1402_v17 = vadd.f32 %v1370_v5, %v1298_v58  ;;  %v941_v19 = vmul.f32 %v909_v61, %v3542_v62  ;;  %2841 = vmatprep.subr.mxu1 %v4947_v6 }
 0x1c9   : > { %v1371_v20 = vmul.f32 %v3538_v60, %v3565_v16  ;;  %v1438_v62 = vmul.f32 %v3561_v14, %v3602_v50  ;;  %v1200_v30 = vmul.f32 %v3511_v38, %v3563_v15  ;;  %v1640_v16 = vadd.f32 %v1608_v7, %v1536_v10 }
 0x1ca   : > { %v847_v4 = vadd.f32 3.0, %v3595_v41  ;;  %v880_v18 = vmax.f32 %v848_v63, 0.0  ;;  %v1641_v32 = vadd.f32 %v1609_v8, %v1537_v11  ;;  %v974_v35 = vmul.f32 0.16666667, %v942_v13 }
 0x1cb   : > { %v3638_v23 = vld [vmem:[#allocation2 + $0x60] sm:$0xff]  ;;  %v1403_v34 = vadd.f32 %v1371_v20, %v1299_v12  ;;  %v1470_v36 = vadd.f32 %v1438_v62, %v1402_v17  ;;  %v973_v42 = vmul.f32 0.16666667, %v941_v19  ;;  %v1677_v45 = vmul.f32 %v3636_v21, %v1571_v27 }
 0x1cc   : > { %v879_v24 = vmax.f32 %v847_v4, 0.0  ;;  %v1268_v40 = vmul.f32 %v3517_v44, %v3638_v23  ;;  %v912_v46 = vmin.f32 %v880_v18, 6.0  ;;  %v1676_v49 = vmul.f32 %v3636_v21, %v1570_v28  ;;  %1063 = vst.msk [vmem:[#allocation2 + $0x81] sm:$0xff] %vm997_vm1, %v974_v35  ;;  %v3677_v18 = vld [vmem:[#allocation2 + $0x68] sm:$0xff] }
 0x1cd   : > { %v1439_v52 = vmul.f32 %v3561_v14, %v3600_v48  ;;  %v1232_v57 = vadd.f32 %v1200_v30, %v1132_v59  ;;  %v1506_v58 = vmul.f32 %v3575_v22, %v3647_v31  ;;  %1062 = vst.msk [vmem:[#allocation2 + $0x79] sm:$0xff] %vm997_vm1, %v973_v42  ;;  %v1709_v0 = vadd.f32 %v1677_v45, %v1641_v32  ;;  %v2794_v12 = vpop.f32.mrf.mxu0 }
 0x1ce   : > { %v911_v53 = vmin.f32 %v879_v24, 6.0  ;;  %v944_v61 = vmul.f32 %v912_v46, %v3583_v33  ;;  %v1708_v63 = vadd.f32 %v1676_v49, %v1640_v16  ;;  %v1745_v7 = vmul.f32 %v3656_v51, %v1573_v54  ;;  %v3682_v24 = vld [vmem:[#allocation3] ss:$0 sm:$0xff]  ;;  %v3710_v49 = vld [vmem:[#allocation2 + $0x61] sm:$0xff] }
 0x1cf   : > { %v1471_v1 = vadd.f32 %v1439_v52, %v1403_v34  ;;  %v1538_v3 = vadd.f32 %v1506_v58, %v1470_v36  ;;  %v1300_v4 = vadd.f32 %v1268_v40, %v1232_v57  ;;  %v1744_v8 = vmul.f32 %v3656_v51, %v1572_v55  ;;  %v738_v40 = vpop.f32.mrf.mxu0  ;;  %v1574_v46 = vld [vmem:[#allocation2 + $0x4a] sm:$0xff] }
 0x1d0   : > { %v943_v2 = vmul.f32 %v911_v53, %v3595_v41  ;;  %v976_v5 = vmul.f32 0.16666667, %v944_v61  ;;  %v1507_v9 = vmul.f32 %v3575_v22, %v3661_v56  ;;  %v1610_v11 = vmul.f32 %v3611_v43, %v1570_v28 }
 0x1d1   : > { %v1372_v33 = vmul.f32 %v3538_v60, %v3602_v50  ;;  %v1611_v41 = vmul.f32 %v3611_v43, %v1571_v27  ;;  %v1776_v13 = vadd.f32 %v1744_v8, %v1708_v63  ;;  %v1777_v17 = vadd.f32 %v1745_v7, %v1709_v0 }
 0x1d2   : > { %v975_v10 = vmul.f32 0.16666667, %v943_v2  ;;  %1065 = vst.msk [vmem:[#allocation2 + $0x99] sm:$0xff] %vm997_vm1, %v976_v5  ;;  %v1539_v19 = vadd.f32 %v1507_v9, %v1471_v1  ;;  %v1373_v20 = vmul.f32 %v3538_v60, %v3600_v48  ;;  %v1201_v50 = vmul.f32 %v3511_v38, %v3578_v29  ;;  %v1575_v1 = vld [vmem:[#allocation2 + $0x52] sm:$0xff] }
 0x1d3   : > { %v1642_v28 = vadd.f32 %v1610_v11, %v1538_v3  ;;  %v1404_v59 = vadd.f32 %v1372_v33, %v1300_v4  ;;  %v3687_v62 = vmul.f32 %v3611_v43, %v1573_v54  ;;  %v1679_v27 = vmul.f32 %v3636_v21, %v1573_v54 }
 0x1d4   : > { %1064 = vst.msk [vmem:[#allocation2 + $0x91] sm:$0xff] %vm997_vm1, %v975_v10  ;;  %v1133_v30 = vmul.f32 %v3508_v37, %v3522_v47  ;;  %v1612_v16 = vmul.f32 %v3611_v43, %v1572_v55  ;;  %v1678_v32 = vmul.f32 %v3636_v21, %v1572_v55  ;;  %v1134_v48 = vmul.f32 %v3508_v37, %v3563_v15  ;;  %v3700_v36 = vld [vmem:[#allocation2 + $0x78] sm:$0xff]  ;;  %v3712_v52 = vld [vmem:[#allocation2 + $0x80] sm:$0xff] }
 0x1d5   : > { %v1440_v34 = vmul.f32 %v3561_v14, %v3647_v31  ;;  %v1269_v35 = vmul.f32 %v3517_v44, %v3677_v18  ;;  %v3703_v42 = vadd.f32 %v3682_v24, %v1776_v13  ;;  %v3706_v47 = vadd.f32 %v3682_v24, %v1777_v17 }
 0x1d6   : > { %v1643_v45 = vadd.f32 %v1611_v41, %v1539_v19  ;;  %v1202_v15 = vmul.f32 %v3511_v38, %v3638_v23  ;;  %v1233_v53 = vadd.f32 %v1201_v50, %v1133_v30  ;;  %v1710_v54 = vadd.f32 %v1678_v32, %v1642_v28 }
 0x1d7   : > { %v1203_v55 = vmul.f32 %v3511_v38, %v3677_v18  ;;  %v1472_v57 = vadd.f32 %v1440_v34, %v1404_v59  ;;  %v1135_v58 = vmul.f32 %v3508_v37, %v3578_v29  ;;  %v1270_v61 = vmul.f32 %v3517_v44, %v3700_v36 }
 0x1d8   : > { %v3721_v63 = vadd.f32 %v2794_v12, %v3480_v39  ;;  %v3724_v0 = vadd.f32 %v3480_v39, %v738_v40  ;;  %v1746_v2 = vmul.f32 %v3656_v51, %v1574_v46  ;;  %v1301_v3 = vadd.f32 %v1269_v35, %v1233_v53  ;;  %v3748_v35 = vld [vmem:[#allocation2 + $0x69] sm:$0xff]  ;;  %v2797_v40 = vpop.f32.mrf.mxu0 }
 0x1d9   : > { %v1508_v4 = vmul.f32 %v3575_v22, %v3710_v49  ;;  %v1271_v5 = vmul.f32 %v3517_v44, %v3712_v52  ;;  %v1847_v29 = vadd.f32 3.0, %v3703_v42  ;;  %v1375_v7 = vmul.f32 %v3538_v60, %v3661_v56 }
 0x1da   : > { %v1711_v8 = vadd.f32 %v1679_v27, %v1643_v45  ;;  %v1234_v9 = vadd.f32 %v1202_v15, %v1134_v48  ;;  %v1848_v10 = vadd.f32 3.0, %v3706_v47  ;;  %v1778_v11 = vadd.f32 %v1746_v2, %v1710_v54 }
 0x1db   : > { %v1235_v33 = vadd.f32 %v1203_v55, %v1135_v58  ;;  %v1540_v12 = vadd.f32 %v1508_v4, %v1472_v57  ;;  %v1747_v41 = vmul.f32 %v3656_v51, %v1575_v1  ;;  %v850_v17 = vadd.f32 3.0, %v3721_v63 }
 0x1dc   : > { %v1302_v13 = vadd.f32 %v1270_v61, %v1234_v9  ;;  %v849_v19 = vadd.f32 3.0, %v3724_v0  ;;  %v1441_v50 = vmul.f32 %v3561_v14, %v3661_v56  ;;  %v3741_v28 = vmul.f32 %v3611_v43, %v1575_v1  ;;  %v3757_v61 = vld [vmem:[#allocation2 + $0x62] sm:$0xff] }
 0x1dd   : > { %v1405_v59 = vadd.f32 %v1373_v20, %v1301_v3  ;;  %v1303_v27 = vadd.f32 %v1271_v5, %v1235_v33  ;;  %v1879_v30 = vmax.f32 %v1847_v29, 0.0  ;;  %v3744_v32 = vmul.f32 %v3636_v21, %v1575_v1  ;;  %v748_v5 = vpop.f32.mrf.mxu0  ;;  %v3774_v33 = vld [vmem:[#allocation2 + $0x81] sm:$0xff] }
 0x1de   : > { %v1374_v48 = vmul.f32 %v3538_v60, %v3647_v31  ;;  %v1779_v34 = vadd.f32 %v1747_v41, %v1711_v8  ;;  %v1880_v45 = vmax.f32 %v1848_v10, 0.0  ;;  %v1614_v15 = vmul.f32 %v3611_v43, %v1574_v46  ;;  %v3770_v10 = vld [vmem:[#allocation2 + $0x79] sm:$0xff] }
 0x1df   : > { %v3752_v56 = vadd.f32 %v3682_v24, %v1778_v11  ;;  %v1644_v53 = vadd.f32 %v1612_v16, %v1540_v12  ;;  %v1680_v20 = vmul.f32 %v3636_v21, %v1574_v46  ;;  %v882_v55 = vmax.f32 %v850_v17, 0.0 }
 0x1e0   : > { %v1406_v54 = vadd.f32 %v1374_v48, %v1302_v13  ;;  %v881_v57 = vmax.f32 %v849_v19, 0.0  ;;  %v1443_v58 = vmul.f32 %v3561_v14, %v3748_v35  ;;  %v1473_v31 = vadd.f32 %v1441_v50, %v1405_v59  ;;  %v3776_v50 = vld [vmem:[#allocation2 + $0x90] sm:$0xff] }
 0x1e1   : > { %v1407_v1 = vadd.f32 %v1375_v7, %v1303_v27  ;;  %v754_v2 = vadd.f32 %v2797_v40, %v3480_v39  ;;  %v1911_v3 = vmin.f32 %v1879_v30, 6.0  ;;  %v3761_v4 = vadd.f32 %v3682_v24, %v1779_v34 }
 0x1e2   : > { %v1509_v16 = vmul.f32 %v3575_v22, %v3748_v35  ;;  %v1442_v46 = vmul.f32 %v3561_v14, %v3710_v49  ;;  %v1912_v29 = vmin.f32 %v1880_v45, 6.0  ;;  %v1849_v8 = vadd.f32 3.0, %v3752_v56 }
 0x1e3   : > { %v1136_v9 = vmul.f32 %v3508_v37, %v3638_v23  ;;  %v1712_v7 = vadd.f32 %v1680_v20, %v1644_v53  ;;  %v1748_v11 = vmul.f32 %v3656_v51, %v3757_v61  ;;  %v914_v41 = vmin.f32 %v882_v55, 6.0 }
 0x1e4   : > { %v1474_v12 = vadd.f32 %v1442_v46, %v1406_v54  ;;  %v913_v13 = vmin.f32 %v881_v57, 6.0  ;;  %v1541_v17 = vadd.f32 %v1509_v16, %v1473_v31  ;;  %v1475_v19 = vadd.f32 %v1443_v58, %v1407_v1  ;;  %v2800_v54 = vpop.f32.mrf.mxu0  ;;  %v3792_v31 = vld [vmem:[#allocation2 + $0x6a] sm:$0xff] }
 0x1e5   : > { %v852_v59 = vadd.f32 3.0, %v754_v2  ;;  %v749_v27 = vadd.f32 %v3480_v39, %v748_v5  ;;  %v1943_v23 = vmul.f32 %v1911_v3, %v3703_v42  ;;  %v1850_v30 = vadd.f32 3.0, %v3761_v4 }
 0x1e6   : > { %v1204_v48 = vmul.f32 %v3511_v38, %v3700_v36  ;;  %v1510_v34 = vmul.f32 %v3575_v22, %v3770_v10  ;;  %v1944_v40 = vmul.f32 %v1912_v29, %v3706_v47  ;;  %v1881_v45 = vmax.f32 %v1849_v8, 0.0 }
 0x1e7   : > { %v1780_v53 = vadd.f32 %v1748_v11, %v1712_v7  ;;  %v1511_v20 = vmul.f32 %v3575_v22, %v3774_v33  ;;  %v1272_v42 = vmul.f32 %v3517_v44, %v3776_v50  ;;  %v946_v57 = vmul.f32 %v914_v41, %v3721_v63  ;;  %v758_v63 = vpop.f32.mrf.mxu0 }
 0x1e8   : > { %v1542_v55 = vadd.f32 %v1510_v34, %v1474_v12  ;;  %v945_v58 = vmul.f32 %v913_v13, %v3724_v0  ;;  %v1645_v1 = vadd.f32 %v3687_v62, %v1541_v17  ;;  %v884_v47 = vmax.f32 %v852_v59, 0.0 }
 0x1e9   : > { %v1543_v3 = vadd.f32 %v1511_v20, %v1475_v19  ;;  %v851_v16 = vadd.f32 3.0, %v749_v27  ;;  %v1882_v46 = vmax.f32 %v1850_v30, 0.0  ;;  %v1236_v5 = vadd.f32 %v1204_v48, %v1136_v9  ;;  %v3814_v20 = vld [vmem:[#allocation2 + $0x7a] sm:$0xff] }
 0x1ea   : > { %v978_v29 = vmul.f32 0.16666667, %v946_v57  ;;  %v977_v8 = vmul.f32 0.16666667, %v945_v58  ;;  %v1913_v7 = vmin.f32 %v1881_v45, 6.0  ;;  %v3796_v11 = vadd.f32 %v3682_v24, %v1780_v53 }
 0x1eb   : > { %v916_v12 = vmin.f32 %v884_v47, 6.0  ;;  %v883_v34 = vmax.f32 %v851_v16, 0.0  ;;  %v3798_v41 = vmul.f32 0.16666667, %v1943_v23  ;;  %v1683_v0 = vmul.f32 %v3636_v21, %v3792_v31 }
 0x1ec   : > { %v1646_v62 = vadd.f32 %v1614_v15, %v1542_v55  ;;  %v1304_v13 = vadd.f32 %v1272_v42, %v1236_v5  ;;  %1067 = vst.msk [vmem:[#allocation2 + $0xb1] sm:$0xff] %vm997_vm1, %v978_v29  ;;  %1066 = vst.msk [vmem:[#allocation2 + $0xa9] sm:$0xff] %vm997_vm1, %v977_v8  ;;  %v3804_v9 = vmul.f32 0.16666667, %v1944_v40  ;;  %v1647_v17 = vadd.f32 %v3741_v28, %v1543_v3  ;;  %v3816_v28 = vpop.f32.mrf.mxu0 }
 0x1ed   : > { %4986 = vst [vmem:[#allocation20_spill] sm:$0xff] %v3798_v41  ;;  %v948_v19 = vmul.f32 %v916_v12, %v754_v2  ;;  %v915_v59 = vmin.f32 %v883_v34, 6.0  ;;  %v1376_v30 = vmul.f32 %v3538_v60, %v3710_v49  ;;  %v1682_v23 = vmul.f32 %v3636_v21, %v3757_v61  ;;  %v1579_v49 = vld [vmem:[#allocation2 + $0x82] sm:$0xff]  ;;  %v3837_v12 = vld [vmem:[#allocation2 + $0x91] sm:$0xff] }
 0x1ee   : > { %4987 = vst [vmem:[#allocation21_spill] sm:$0xff] %v3804_v9  ;;  %v1713_v48 = vadd.f32 %v3744_v32, %v1645_v1  ;;  %v1914_v15 = vmin.f32 %v1882_v46, 6.0  ;;  %v1945_v45 = vmul.f32 %v1913_v7, %v3752_v56  ;;  %v1851_v53 = vadd.f32 3.0, %v3796_v11  ;;  %v3830_v46 = vld [vmem:[#allocation2 + $0x98] sm:$0xff] }
 0x1ef   : > { %v980_v40 = vmul.f32 0.16666667, %v948_v19  ;;  %v947_v55 = vmul.f32 %v915_v59, %v749_v27  ;;  %v1749_v2 = vmul.f32 %v3656_v51, %v3792_v31  ;;  %v1714_v42 = vadd.f32 %v1682_v23, %v1646_v62 }
 0x1f0   : > { %v1408_v57 = vadd.f32 %v1376_v30, %v1304_v13  ;;  %v2007_v32 = vsel %vm997_vm1, %v3798_v41, 0.0  ;;  %v2008_v56 = vsel %vm997_vm1, %v3804_v9, 0.0  ;;  %v1715_v58 = vadd.f32 %v1683_v0, %v1647_v17 }
 0x1f1   : > { %1069 = vst.msk [vmem:[#allocation2 + $0xc9] sm:$0xff] %vm997_vm1, %v980_v40  ;;  %v979_v1 = vmul.f32 0.16666667, %v947_v55  ;;  %v1781_v3 = vadd.f32 %v1749_v2, %v1713_v48  ;;  %v1946_v27 = vmul.f32 %v1914_v15, %v3761_v4  ;;  %v1444_v47 = vmul.f32 %v3561_v14, %v3770_v10  ;;  %v768_v4 = vpop.f32.mrf.mxu0 }
 0x1f2   : > { %v1750_v16 = vmul.f32 %v3656_v51, %v3814_v20  ;;  %v3832_v5 = vmul.f32 0.16666667, %v1945_v45  ;;  %v1883_v29 = vmax.f32 %v1851_v53, 0.0  ;;  %v1751_v8 = vmul.f32 %v3656_v51, %v1579_v49 }
 0x1f3   : > { %v1205_v7 = vmul.f32 %v3511_v38, %v3712_v52  ;;  %1068 = vst.msk [vmem:[#allocation2 + $0xc1] sm:$0xff] %vm997_vm1, %v979_v1  ;;  %v1476_v0 = vadd.f32 %v1444_v47, %v1408_v57  ;;  %v3841_v62 = vadd.f32 %v2800_v54, %v3480_v39  ;;  %v3844_v13 = vadd.f32 %v3480_v39, %v758_v63  ;;  %v2806_v53 = vpop.f32.mrf.mxu0 }
 0x1f4   : > { %4988 = vst [vmem:[#allocation22_spill] sm:$0xff] %v3832_v5  ;;  %v1782_v34 = vadd.f32 %v1750_v16, %v1714_v42  ;;  %v1377_v17 = vmul.f32 %v3538_v60, %v3748_v35  ;;  %v1137_v19 = vmul.f32 %v3508_v37, %v3677_v18  ;;  %v1783_v59 = vadd.f32 %v1751_v8, %v1715_v58 }
 0x1f5   : > { %v1273_v30 = vmul.f32 %v3517_v44, %v3830_v46  ;;  %v2009_v23 = vadd.f32 %v2008_v56, %v2007_v32  ;;  %v3854_v48 = vmul.f32 %v3611_v43, %v3792_v31  ;;  %v3857_v54 = vadd.f32 %v3682_v24, %v1781_v3  ;;  %v3893_v8 = vpop.f32.mrf.mxu0 }
 0x1f6   : > { %v1512_v63 = vmul.f32 %v3575_v22, %v3837_v12  ;;  %v2010_v35 = vsel %vm997_vm1, %v3832_v5, 0.0  ;;  %v1915_v15 = vmin.f32 %v1883_v29, 6.0  ;;  %v3863_v18 = vmul.f32 0.16666667, %v1946_v27 }
 0x1f7   : > { %v1237_v45 = vadd.f32 %v1205_v7, %v1137_v19  ;;  %v3866_v40 = vadd.f32 %v3682_v24, %v1782_v34  ;;  %v854_v31 = vadd.f32 3.0, %v3841_v62  ;;  %v853_v2 = vadd.f32 3.0, %v3844_v13  ;;  %v1341_v7 = vld [vmem:[#allocation2 + $0x99] sm:$0xff] }
 0x1f8   : > { %4989 = vst [vmem:[#allocation23_spill] sm:$0xff] %v3863_v18  ;;  %v1544_v55 = vadd.f32 %v1512_v63, %v1476_v0  ;;  %v1616_v42 = vmul.f32 %v3611_v43, %v3757_v61  ;;  %v3874_v57 = vmul.f32 %v3538_v60, %v3774_v33  ;;  %v3877_v32 = vadd.f32 %v3682_v24, %v1783_v59 }
 0x1f9   : > { %v1305_v56 = vadd.f32 %v1273_v30, %v1237_v45  ;;  %v2011_v58 = vadd.f32 %v2010_v35, %v2009_v23  ;;  %v1445_v1 = vmul.f32 %v3561_v14, %v3774_v33  ;;  %v3882_v3 = vmul.f32 %v3611_v43, %v1579_v49  ;;  %v3921_v45 = vld [vmem:[#allocation2 + $0x92] sm:$0xff] }
 0x1fa   : > { %v3885_v27 = vmul.f32 %v3636_v21, %v1579_v49  ;;  %v1947_v61 = vmul.f32 %v1915_v15, %v3796_v11  ;;  %v2012_v47 = vsel %vm997_vm1, %v3863_v18, 0.0  ;;  %v1138_v16 = vmul.f32 %v3508_v37, %v3700_v36 }
 0x1fb   : > { %4990 = vst [vmem:[#allocation24_spill] sm:$0xff] %v3882_v3  ;;  %v1852_v29 = vadd.f32 3.0, %v3857_v54  ;;  %v1853_v33 = vadd.f32 3.0, %v3866_v40  ;;  %v1648_v34 = vadd.f32 %v1616_v42, %v1544_v55  ;;  %v886_v0 = vmax.f32 %v854_v31, 0.0 }
 0x1fc   : > { %v885_v19 = vmax.f32 %v853_v2, 0.0  ;;  %v1409_v49 = vadd.f32 %v1377_v17, %v1305_v56  ;;  %v1854_v59 = vadd.f32 3.0, %v3877_v32  ;;  %v774_v11 = vadd.f32 %v3816_v28, %v3480_v39 }
 0x1fd   : > { %v769_v30 = vadd.f32 %v3480_v39, %v768_v4  ;;  %v3900_v23 = vadd.f32 %v2012_v47, %v2011_v58  ;;  %v3904_v36 = vmul.f32 %v3508_v37, %v3712_v52  ;;  %v3908_v63 = vmul.f32 %v3538_v60, %v3770_v10  ;;  %v3923_v52 = vpop.f32.mrf.mxu0  ;;  %v1581_v10 = vld [vmem:[#allocation2 + $0x9a] sm:$0xff] }
 0x1fe   : > { %v1684_v17 = vmul.f32 %v3636_v21, %v3814_v20  ;;  %v3912_v35 = vmul.f32 0.16666667, %v1947_v61  ;;  %v3916_v28 = vmul.f32 %v3611_v43, %v3814_v20  ;;  %v1884_v4 = vmax.f32 %v1852_v29, 0.0 }
 0x1ff   : > { %v3919_v15 = vmul.f32 %v3538_v60, %v1341_v7  ;;  %v1885_v55 = vmax.f32 %v1853_v33, 0.0  ;;  %v918_v2 = vmin.f32 %v886_v0, 6.0  ;;  %v917_v42 = vmin.f32 %v885_v19, 6.0  ;;  %v3940_v0 = vpop.f32.mrf.mxu0 }
 0x200   : > { %4991 = vst [vmem:[#allocation25_spill] sm:$0xff] %v3912_v35  ;;  %v1716_v31 = vadd.f32 %v1684_v17, %v1648_v34  ;;  %v1477_v56 = vadd.f32 %v1445_v1, %v1409_v49  ;;  %v1886_v58 = vmax.f32 %v1854_v59, 0.0  ;;  %v856_v61 = vadd.f32 3.0, %v774_v11 }
 0x201   : > { %v855_v47 = vadd.f32 3.0, %v769_v30  ;;  %v3926_v20 = vmul.f32 %v3561_v14, %v1341_v7  ;;  %v1513_v29 = vmul.f32 %v3575_v22, %v1341_v7  ;;  %v1752_v26 = vmul.f32 %v3656_v51, %v3921_v45  ;;  %v3942_v7 = vld [vmem:[#allocation2 + $0xa8] sm:$0xff] }
 0x202   : > { %v784_v6 = vadd.f32 %v2806_v53, %v3480_v39  ;;  %v1916_v41 = vmin.f32 %v1884_v4, 6.0  ;;  %v3933_v33 = vmul.f32 %v3611_v43, %v1581_v10  ;;  %v3936_v34 = vmul.f32 %v3636_v21, %v1581_v10 }
 0x203   : > { %v1206_v1 = vmul.f32 %v3511_v38, %v3776_v50  ;;  %v1917_v19 = vmin.f32 %v1885_v55, 6.0  ;;  %v1784_v49 = vadd.f32 %v1752_v26, %v1716_v31  ;;  %v950_v59 = vmul.f32 %v918_v2, %v3841_v62  ;;  %v3951_v62 = vpop.f32.mrf.mxu0 }
 0x204   : > { %4992 = vst [vmem:[#allocation26_spill] sm:$0xff] %v3933_v33  ;;  %4993 = vst [vmem:[#allocation27_spill] sm:$0xff] %v3936_v34  ;;  %v949_v53 = vmul.f32 %v917_v42, %v3844_v13  ;;  %v1545_v17 = vadd.f32 %v1513_v29, %v1477_v56  ;;  %v1918_v4 = vmin.f32 %v1886_v58, 6.0  ;;  %v888_v9 = vmax.f32 %v856_v61, 0.0 }
 0x205   : > { %v887_v5 = vmax.f32 %v855_v47, 0.0  ;;  %v2014_v18 = vsel %vm997_vm1, %v3912_v35, 0.0  ;;  %v982_v25 = vmul.f32 0.16666667, %v950_v59  ;;  %v858_v34 = vadd.f32 3.0, %v784_v6 }
 0x206   : > { %v981_v33 = vmul.f32 0.16666667, %v949_v53  ;;  %v1948_v3 = vmul.f32 %v1916_v41, %v3857_v54  ;;  %v1274_v26 = vmul.f32 %v3517_v44, %v3942_v7  ;;  %v920_v55 = vmin.f32 %v888_v9, 6.0 }
 0x207   : > { %v919_v31 = vmin.f32 %v887_v5, 6.0  ;;  %v1949_v13 = vmul.f32 %v1917_v19, %v3866_v40  ;;  %v1238_v2 = vadd.f32 %v1206_v1, %v1138_v16  ;;  %v3955_v42 = vadd.f32 %v3682_v24, %v1784_v49  ;;  %1071 = vst.msk [vmem:[#allocation2 + $0xe1] sm:$0xff] %vm997_vm1, %v982_v25 }
 0x208   : > { %1070 = vst.msk [vmem:[#allocation2 + $0xd9] sm:$0xff] %vm997_vm1, %v981_v33  ;;  %v890_v56 = vmax.f32 %v858_v34, 0.0  ;;  %v1649_v41 = vadd.f32 %v3854_v48, %v1545_v17  ;;  %v1950_v54 = vmul.f32 %v1918_v4, %v3877_v32  ;;  %v952_v58 = vmul.f32 %v920_v55, %v774_v11  ;;  %v798_v33 = vpop.f32.mrf.mxu0  ;;  %v1343_v4 = vld [vmem:[#allocation2 + $0xb1] sm:$0xff] }
 0x209   : > { %v951_v9 = vmul.f32 %v919_v31, %v769_v30  ;;  %v1753_v5 = vmul.f32 %v3656_v51, %v1581_v10  ;;  %v1140_v40 = vmul.f32 %v3508_v37, %v3776_v50  ;;  %v3966_v16 = vmul.f32 %v3508_v37, %v3830_v46  ;;  %v1583_v31 = vld [vmem:[#allocation2 + $0xb2] sm:$0xff] }
 0x20a   : > { %v922_v61 = vmin.f32 %v890_v56, 6.0  ;;  %v1207_v25 = vmul.f32 %v3511_v38, %v3830_v46  ;;  %v1306_v47 = vadd.f32 %v1274_v26, %v1238_v2  ;;  %v984_v29 = vmul.f32 0.16666667, %v952_v58  ;;  %v3981_v46 = vld [vmem:[#allocation2 + $0xc0] sm:$0xff]  ;;  %v4003_v17 = vpop.f32.mrf.mxu0  ;;  %v1342_v56 = vld [vmem:[#allocation2 + $0xa9] sm:$0xff] }
 0x20b   : > { %v983_v48 = vmul.f32 0.16666667, %v951_v9  ;;  %v3970_v32 = vmul.f32 0.16666667, %v1948_v3  ;;  %v3972_v11 = vmul.f32 0.16666667, %v1949_v13  ;;  %v2015_v50 = vadd.f32 %v2014_v18, %v3900_v23 }
 0x20c   : > { %v1855_v30 = vadd.f32 3.0, %v3955_v42  ;;  %v954_v10 = vmul.f32 %v922_v61, %v784_v6  ;;  %v1380_v34 = vmul.f32 %v3538_v60, %v3837_v12  ;;  %v1717_v1 = vadd.f32 %v3885_v27, %v1649_v41  ;;  %1073 = vst.msk [vmem:[#allocation2 + $0xf9] sm:$0xff] %vm997_vm1, %v984_v29  ;;  %v1103_v13 = vld [vmem:[#allocation2 + $0xb0] sm:$0xff]  ;;  %v4025_v58 = vld [vmem:[%s4934_s2] ss:$0 sm:$0xff] }
 0x20d   : > { %4994 = vst [vmem:[#allocation28_spill] sm:$0xff] %v3970_v32  ;;  %4995 = vst [vmem:[#allocation29_spill] sm:$0xff] %v3972_v11  ;;  %v3979_v19 = vmul.f32 0.16666667, %v1950_v54  ;;  %v1208_v3 = vmul.f32 %v3511_v38, %v3942_v7  ;;  %v3989_v6 = vadd.f32 %v3480_v39, %v3893_v8  ;;  %v3993_v18 = vadd.f32 %v3923_v52, %v3480_v39 }
 0x20e   : > { %1072 = vst.msk [vmem:[#allocation2 + $0xf1] sm:$0xff] %vm997_vm1, %v983_v48  ;;  %v986_v49 = vmul.f32 0.16666667, %v954_v10  ;;  %v1239_v27 = vadd.f32 %v1207_v25, %v3904_v36  ;;  %v1446_v23 = vmul.f32 %v3561_v14, %v3837_v12  ;;  %v4000_v59 = vmul.f32 %v3611_v43, %v3921_v45  ;;  %v4037_v25 = vpop.f32.mrf.mxu0 }
 0x20f   : > { %4996 = vst [vmem:[#allocation30_spill] sm:$0xff] %v3979_v19  ;;  %v1410_v53 = vadd.f32 %v3908_v63, %v1306_v47  ;;  %v2016_v8 = vsel %vm997_vm1, %v3970_v32, 0.0  ;;  %v2018_v39 = vsel %vm997_vm1, %v3972_v11, 0.0  ;;  %v1887_v52 = vmax.f32 %v1855_v30, 0.0  ;;  %v4076_v32 = vld [vmem:[#allocation2 + $0xca] sm:$0xff] }
 0x210   : > { %v1276_v36 = vmul.f32 %v3517_v44, %v3981_v46  ;;  %1075 = vst.msk [vmem:[#allocation2 + $0x111] sm:$0xff] %vm997_vm1, %v986_v49  ;;  %v2017_v12 = vadd.f32 %v2016_v8, %v2015_v50  ;;  %v4014_v26 = vmul.f32 %v3636_v21, %v3921_v45  ;;  %v4016_v63 = vadd.f32 %v1753_v5, %v1717_v1 }
 0x211   : > { %v2020_v55 = vsel %vm997_vm1, %v3979_v19, 0.0  ;;  %v1240_v2 = vadd.f32 %v1208_v3, %v1140_v40  ;;  %v857_v41 = vadd.f32 3.0, %v3989_v6  ;;  %v860_v54 = vadd.f32 3.0, %v3993_v18 }
 0x212   : > { %4997 = vst [vmem:[#allocation31_spill] sm:$0xff] %v4016_v63  ;;  %v4029_v45 = vadd.f32 %v4025_v58, %v3940_v0  ;;  %v2019_v9 = vadd.f32 %v2018_v39, %v2017_v12  ;;  %v4032_v5 = vmul.f32 %v3538_v60, %v1343_v4  ;;  %v4035_v40 = vmul.f32 %v3561_v14, %v1343_v4  ;;  %v2818_v12 = vpop.f32.mrf.mxu0 }
 0x213   : > { %v1478_v61 = vadd.f32 %v1446_v23, %v1410_v53  ;;  %v1919_v47 = vmin.f32 %v1887_v52, 6.0  ;;  %v4040_v29 = vmul.f32 %v3575_v22, %v1343_v4  ;;  %v4043_v48 = vmul.f32 %v3611_v43, %v1583_v31  ;;  %v1582_v52 = vld [vmem:[#allocation2 + $0xaa] sm:$0xff] }
 0x214   : > { %v1308_v30 = vadd.f32 %v1276_v36, %v1240_v2  ;;  %v4046_v0 = vmul.f32 %v3636_v21, %v1583_v31  ;;  %v1209_v10 = vmul.f32 %v3511_v38, %v1103_v13  ;;  %v1275_v50 = vmul.f32 %v3517_v44, %v1103_v13 }
 0x215   : > { %4998 = vst [vmem:[#allocation32_spill] sm:$0xff] %v4043_v48  ;;  %v1514_v1 = vmul.f32 %v3575_v22, %v1342_v56  ;;  %v4052_v3 = vmul.f32 %v3656_v51, %v1583_v31  ;;  %v889_v49 = vmax.f32 %v857_v41, 0.0  ;;  %v892_v23 = vmax.f32 %v860_v54, 0.0 }
 0x216   : > { %4999 = vst [vmem:[#allocation33_spill] sm:$0xff] %v4046_v0  ;;  %v859_v53 = vadd.f32 3.0, %v4029_v45  ;;  %v4057_v8 = vmul.f32 %v3508_v37, %v3942_v7  ;;  %v804_v4 = vadd.f32 %v4025_v58, %v3951_v62  ;;  %v799_v36 = vadd.f32 %v4025_v58, %v798_v33  ;;  %v1345_v62 = vld [vmem:[#allocation2 + $0xc9] sm:$0xff] }
 0x217   : > { %5000 = vst [vmem:[#allocation34_spill] sm:$0xff] %v4052_v3  ;;  %v1546_v39 = vadd.f32 %v1514_v1, %v1478_v61  ;;  %v1951_v2 = vmul.f32 %v1919_v47, %v3955_v42  ;;  %v4063_v31 = vadd.f32 %v2020_v55, %v2019_v9  ;;  %v4066_v41 = vmul.f32 %v3508_v37, %v1103_v13 }
 0x218   : > { %v1412_v54 = vadd.f32 %v1380_v34, %v1308_v30  ;;  %v1241_v35 = vadd.f32 %v1209_v10, %v3966_v16  ;;  %v1307_v7 = vadd.f32 %v1275_v50, %v1239_v27  ;;  %v4070_v61 = vmul.f32 %v3538_v60, %v1342_v56  ;;  %v4082_v16 = vld [vmem:[#allocation2 + $0xc1] sm:$0xff]  ;;  %v818_v30 = vpop.f32.mrf.mxu0 }
 0x219   : > { %v1448_v1 = vmul.f32 %v3561_v14, %v1342_v56  ;;  %v4074_v33 = vmul.f32 %v3611_v43, %v1582_v52  ;;  %v921_v42 = vmin.f32 %v889_v49, 6.0  ;;  %v924_v55 = vmin.f32 %v892_v23, 6.0  ;;  %v4090_v49 = vld [vmem:[#allocation2 + $0xc8] sm:$0xff] }
 0x21a   : > { %v891_v9 = vmax.f32 %v859_v53, 0.0  ;;  %v1650_v13 = vadd.f32 %v3916_v28, %v1546_v39  ;;  %v4080_v34 = vmul.f32 %v3636_v21, %v1582_v52  ;;  %v862_v27 = vadd.f32 3.0, %v804_v4  ;;  %v2821_v63 = vpop.f32.mrf.mxu0 }
 0x21b   : > { %v861_v47 = vadd.f32 3.0, %v799_v36  ;;  %v4084_v56 = vmul.f32 0.16666667, %v1951_v2  ;;  %v1754_v10 = vmul.f32 %v3656_v51, %v1582_v52  ;;  %v4088_v50 = vmul.f32 %v3538_v60, %v1345_v62 }
 0x21c   : > { %v1480_v23 = vadd.f32 %v1448_v1, %v1412_v54  ;;  %v1411_v28 = vadd.f32 %v3874_v57, %v1307_v7  ;;  %v4094_v53 = vmul.f32 %v3561_v14, %v1345_v62  ;;  %v4097_v39 = vmul.f32 %v3575_v22, %v1345_v62 }
 0x21d   : > { %5001 = vst [vmem:[#allocation35_spill] sm:$0xff] %v4084_v56  ;;  %5002 = vst [vmem:[#allocation36_spill] sm:$0xff] %v4088_v50  ;;  %v4101_v2 = vmul.f32 %v3611_v43, %v4076_v32  ;;  %v1516_v52 = vmul.f32 %v3575_v22, %v4082_v16  ;;  %v953_v11 = vmul.f32 %v921_v42, %v3989_v6  ;;  %v923_v54 = vmin.f32 %v891_v9, 6.0 }
 0x21e   : > { %v956_v19 = vmul.f32 %v924_v55, %v3993_v18  ;;  %v1718_v57 = vadd.f32 %v4014_v26, %v1650_v13  ;;  %v1277_v7 = vmul.f32 %v3517_v44, %v4090_v49  ;;  %v894_v1 = vmax.f32 %v862_v27, 0.0 }
 0x21f   : > { %5003 = vst [vmem:[#allocation37_spill] sm:$0xff] %v4101_v2  ;;  %v893_v62 = vmax.f32 %v861_v47, 0.0  ;;  %v1548_v3 = vadd.f32 %v1516_v52, %v1480_v23  ;;  %v985_v0 = vmul.f32 0.16666667, %v953_v11  ;;  %v955_v2 = vmul.f32 %v923_v54, %v4029_v45  ;;  %v4134_v23 = vld [vmem:[#allocation2 + $0xd8] sm:$0xff] }
 0x220   : > { %v988_v48 = vmul.f32 0.16666667, %v956_v19  ;;  %v2022_v50 = vsel %vm997_vm1, %v4084_v56, 0.0  ;;  %v4115_v6 = vmul.f32 %v3636_v21, %v4076_v32  ;;  %v926_v18 = vmin.f32 %v894_v1, 6.0 }
 0x221   : > { %v925_v26 = vmin.f32 %v893_v62, 6.0  ;;  %1074 = vst.msk [vmem:[#allocation2 + $0x109] sm:$0xff] %vm997_vm1, %v985_v0  ;;  %v987_v42 = vmul.f32 0.16666667, %v955_v2  ;;  %v814_v11 = vadd.f32 %v4025_v58, %v4003_v17  ;;  %v4123_v19 = vadd.f32 %v4025_v58, %v4037_v25  ;;  %v828_v0 = vpop.f32.mrf.mxu0 }
 0x222   : > { %5004 = vst [vmem:[#allocation38_spill] sm:$0xff] %v4115_v6  ;;  %1077 = vst.msk [vmem:[#allocation2 + $0x129] sm:$0xff] %vm997_vm1, %v988_v48  ;;  %v4126_v45 = vadd.f32 %v4025_v58, %v2818_v12  ;;  %v1786_v55 = vadd.f32 %v1754_v10, %v1718_v57  ;;  %v958_v9 = vmul.f32 %v926_v18, %v804_v4  ;;  %v5006_v62 = vmov 0.0  }
 0x223   : > { %v957_v13 = vmul.f32 %v925_v26, %v799_v36  ;;  %v4129_v27 = vadd.f32 %v4025_v58, %v818_v30  ;;  %v1210_v48 = vmul.f32 %v3511_v38, %v3981_v46  ;;  %v1309_v47 = vadd.f32 %v1277_v7, %v1241_v35  ;;  %1076 = vst.msk [vmem:[#allocation2 + $0x121] sm:$0xff] %vm997_vm1, %v987_v42  ;;  %v4139_v30 = vld [vmem:[#allocation2 + $0xc2] sm:$0xff] }
 0x224   : > { %v1652_v17 = vadd.f32 %v4000_v59, %v1548_v3  ;;  %v864_v25 = vadd.f32 3.0, %v814_v11  ;;  %v990_v12 = vmul.f32 0.16666667, %v958_v9  ;;  %v863_v4 = vadd.f32 3.0, %v4123_v19  ;;  %2838 = vmatprep.mubr.msk.f32.mxu1 %vm3129_vm3, %v5006_v62 }
 0x225   : > { %v989_v2 = vmul.f32 0.16666667, %v957_v13  ;;  %v866_v36 = vadd.f32 3.0, %v4126_v45  ;;  %v865_v52 = vadd.f32 3.0, %v4129_v27  ;;  %v4143_v35 = vadd.f32 %v4025_v58, %v2821_v63 }
 0x226   : > { %v896_v10 = vmax.f32 %v864_v25, 0.0  ;;  %v4146_v59 = vadd.f32 %v4025_v58, %v828_v0  ;;  %v4149_v3 = vadd.f32 %v3682_v24, %v1786_v55  ;;  %v4153_v54 = vmul.f32 %v3656_v51, %v4076_v32  ;;  %1079 = vst.msk [vmem:[#allocation2 + $0x141] sm:$0xff] %vm997_vm1, %v990_v12  ;;  %v4189_v12 = vld [vmem:[#allocation2 + $0xe0] sm:$0xff] }
 0x227   : > { %v1278_v57 = vmul.f32 %v3517_v44, %v4134_v23  ;;  %1078 = vst.msk [vmem:[#allocation2 + $0x139] sm:$0xff] %vm997_vm1, %v989_v2  ;;  %v1479_v63 = vadd.f32 %v3926_v20, %v1411_v28  ;;  %v1144_v58 = vmul.f32 %v3508_v37, %v3981_v46  ;;  %v1413_v7 = vadd.f32 %v3919_v15, %v1309_v47 }
 0x228   : > { %5005 = vst [vmem:[#allocation39_spill] sm:$0xff] %v4153_v54  ;;  %v1720_v1 = vadd.f32 %v4080_v34, %v1652_v17  ;;  %v1242_v32 = vadd.f32 %v1210_v48, %v4057_v8  ;;  %v1756_v18 = vmul.f32 %v3656_v51, %v4139_v30  ;;  %v895_v26 = vmax.f32 %v863_v4, 0.0 }
 0x229   : > { %v898_v42 = vmax.f32 %v866_v36, 0.0  ;;  %v928_v55 = vmin.f32 %v896_v10, 6.0  ;;  %v897_v20 = vmax.f32 %v865_v52, 0.0  ;;  %v868_v28 = vadd.f32 3.0, %v4143_v35 }
 0x22a   : > { %v867_v46 = vadd.f32 3.0, %v4146_v59  ;;  %v4172_v15 = vadd.f32 %v2022_v50, %v4063_v31  ;;  %v1857_v34 = vadd.f32 3.0, %v4149_v3  ;;  %v1211_v9 = vmul.f32 %v3511_v38, %v4090_v49  ;;  %v4187_v50 = vld [vmem:[#allocation2 + $0xf0] sm:$0xff] }
 0x22b   : > { %v1310_v8 = vadd.f32 %v1278_v57, %v1242_v32  ;;  %v1547_v13 = vadd.f32 %v4040_v29, %v1479_v63  ;;  %v4180_v51 = vmul.f32 %v3508_v37, %v4090_v49  ;;  %v1481_v0 = vadd.f32 %v4035_v40, %v1413_v7  ;;  %v5008_v57 = vld [vmem:[#allocation24_spill] sm:$0xff] }
 0x22c   : > { %5007 = vst [vmem:[#allocation40_spill] sm:$0xff] %v4172_v15  ;;  %v1788_v48 = vadd.f32 %v1756_v18, %v1720_v1  ;;  %v1384_v47 = vmul.f32 %v3538_v60, %v4082_v16  ;;  %v1212_v31 = vmul.f32 %v3511_v38, %v4134_v23  ;;  %v927_v17 = vmin.f32 %v895_v26, 6.0 }
 0x22d   : > { %v930_v25 = vmin.f32 %v898_v42, 6.0  ;;  %v960_v29 = vmul.f32 %v928_v55, %v814_v11  ;;  %v929_v2 = vmin.f32 %v897_v20, 6.0  ;;  %v900_v4 = vmax.f32 %v868_v28, 0.0  ;;  %v1346_v20 = vld [vmem:[#allocation2 + $0xd9] sm:$0xff] }
 0x22e   : > { %v899_v49 = vmax.f32 %v867_v46, 0.0  ;;  %v1889_v36 = vmax.f32 %v1857_v34, 0.0  ;;  %v1243_v40 = vadd.f32 %v1211_v9, %v4066_v41  ;;  %v1450_v10 = vmul.f32 %v3561_v14, %v4082_v16  ;;  %v4208_v34 = vld [vmem:[#allocation2 + $0xf8] sm:$0xff]  ;;  %v1115_v56 = vld [vmem:[#allocation2 + $0x140] sm:$0xff] }
 0x22f   : > { %v1414_v52 = vadd.f32 %v4070_v61, %v1310_v8  ;;  %v1651_v63 = vadd.f32 %v5008_v57, %v1547_v13  ;;  %v1549_v7 = vadd.f32 %v4097_v39, %v1481_v0  ;;  %v4198_v1 = vadd.f32 %v3682_v24, %v1788_v48  ;;  %v1347_v0 = vld [vmem:[#allocation2 + $0xe1] sm:$0xff] }
 0x230   : > { %v1280_v11 = vmul.f32 %v3517_v44, %v4187_v50  ;;  %v1279_v32 = vmul.f32 %v3517_v44, %v4189_v12  ;;  %v992_v18 = vmul.f32 0.16666667, %v960_v29  ;;  %v959_v41 = vmul.f32 %v927_v17, %v4123_v19  ;;  %v5010_v29 = vld [vmem:[#allocation27_spill] sm:$0xff] }
 0x231   : > { %5009 = vst [vmem:[#allocation24_spill] sm:$0xff] %v4198_v1  ;;  %v962_v16 = vmul.f32 %v930_v25, %v4126_v45  ;;  %v1244_v26 = vadd.f32 %v1212_v31, %v1144_v58  ;;  %v961_v61 = vmul.f32 %v929_v2, %v4129_v27  ;;  %v932_v42 = vmin.f32 %v900_v4, 6.0  ;;  %v5012_v4 = vld [vmem:[#allocation26_spill] sm:$0xff] }
 0x232   : > { %v931_v55 = vmin.f32 %v899_v49, 6.0  ;;  %v1921_v39 = vmin.f32 %v1889_v36, 6.0  ;;  %v1482_v24 = vadd.f32 %v1450_v10, %v1414_v52  ;;  %1081 = vst.msk [vmem:[#allocation2 + $0x159] sm:$0xff] %vm997_vm1, %v992_v18  ;;  %v991_v28 = vmul.f32 0.16666667, %v959_v41 }
 0x233   : > { %v994_v46 = vmul.f32 0.16666667, %v962_v16  ;;  %v1312_v9 = vadd.f32 %v1280_v11, %v1244_v26  ;;  %v993_v8 = vmul.f32 0.16666667, %v961_v61  ;;  %v964_v19 = vmul.f32 %v932_v42, %v4143_v35  ;;  %v1587_v35 = vld [vmem:[#allocation2 + $0xe2] sm:$0xff]  ;;  %v1586_v26 = vld [vmem:[#allocation2 + $0xda] sm:$0xff] }
 0x234   : > { %v963_v45 = vmul.f32 %v931_v55, %v4146_v59  ;;  %v4214_v27 = vmul.f32 %v3611_v43, %v4139_v30  ;;  %v1690_v58 = vmul.f32 %v3636_v21, %v4139_v30  ;;  %v1859_v13 = vadd.f32 3.0, %v4198_v1  ;;  %1080 = vst.msk [vmem:[#allocation2 + $0x151] sm:$0xff] %vm997_vm1, %v991_v28  ;;  %v4251_v18 = vld [vmem:[%s4935_s3 + $0x8] ss:$0 sm:$0xff] }
 0x235   : > { %v1213_v48 = vmul.f32 %v3511_v38, %v4189_v12  ;;  %1083 = vst.msk [vmem:[#allocation2 + $0x171] sm:$0xff] %vm997_vm1, %v994_v46  ;;  %v1311_v31 = vadd.f32 %v1279_v32, %v1243_v40  ;;  %v1518_v59 = vmul.f32 %v3575_v22, %v1346_v20  ;;  %1082 = vst.msk [vmem:[#allocation2 + $0x169] sm:$0xff] %vm997_vm1, %v993_v8  ;;  %v996_v17 = vmul.f32 0.16666667, %v964_v19  ;;  %v1110_v61 = vld [vmem:[#allocation2 + $0x108] sm:$0xff] }
 0x236   : > { %v995_v25 = vmul.f32 0.16666667, %v963_v45  ;;  %v4226_v30 = vadd.f32 %v5010_v29, %v1651_v63  ;;  %v1953_v2 = vmul.f32 %v1921_v39, %v4149_v3  ;;  %v4230_v49 = vadd.f32 %v5012_v4, %v1549_v7  ;;  %5016 = vst [vmem:[#allocation43_spill] sm:$0xff] %v4251_v18  ;;  %v4291_v29 = vld [vmem:[#allocation2 + $0xf2] sm:$0xff] }
 0x237   : > { %v1281_v36 = vmul.f32 %v3517_v44, %v4208_v34  ;;  %v4235_v10 = vmul.f32 %v3538_v60, %v1347_v0  ;;  %v1453_v40 = vmul.f32 %v3561_v14, %v1347_v0  ;;  %v1550_v52 = vadd.f32 %v1518_v59, %v1482_v24  ;;  %1085 = vst.msk [vmem:[#allocation2 + $0x189] sm:$0xff] %vm997_vm1, %v996_v17  ;;  %v1348_v24 = vld [vmem:[#allocation2 + $0xf1] sm:$0xff]  ;;  %v5023_v17 = vld [vmem:[#allocation36_spill] sm:$0xff] }
 0x238   : > { %5011 = vst [vmem:[#allocation27_spill] sm:$0xff] %v4226_v30  ;;  %5013 = vst [vmem:[#allocation26_spill] sm:$0xff] %v4230_v49  ;;  %v1416_v57 = vadd.f32 %v1384_v47, %v1312_v9  ;;  %v1891_v63 = vmax.f32 %v1859_v13, 0.0  ;;  %v1519_v3 = vmul.f32 %v3575_v22, %v1347_v0  ;;  %v4242_v7 = vmul.f32 %v3611_v43, %v1587_v35  ;;  %v1349_v9 = vld [vmem:[#allocation2 + $0xf9] sm:$0xff] }
 0x239   : > { %1084 = vst.msk [vmem:[#allocation2 + $0x181] sm:$0xff] %vm997_vm1, %v995_v25  ;;  %v1245_v11 = vadd.f32 %v1213_v48, %v4180_v51  ;;  %v4246_v32 = vmul.f32 %v3636_v21, %v1587_v35  ;;  %v4254_v47 = vmul.f32 %v4251_v18, %v1587_v35  ;;  %v1415_v41 = vadd.f32 %v4032_v5, %v1311_v31  ;;  %v4276_v13 = vld [vmem:[#allocation2 + $0xfa] sm:$0xff] }
 0x23a   : > { %5014 = vst [vmem:[#allocation41_spill] sm:$0xff] %v4242_v7  ;;  %v1452_v16 = vmul.f32 %v3561_v14, %v1346_v20  ;;  %v4258_v42 = vmul.f32 0.16666667, %v1953_v2  ;;  %v1146_v51 = vmul.f32 %v3508_v37, %v4134_v23  ;;  %v1214_v55 = vmul.f32 %v3511_v38, %v4187_v50  ;;  %5022 = vst [vmem:[#allocation49_spill] sm:$0xff] %v4276_v13 }
 0x23b   : > { %5015 = vst [vmem:[#allocation42_spill] sm:$0xff] %v4246_v32  ;;  %5017 = vst [vmem:[#allocation44_spill] sm:$0xff] %v4254_v47  ;;  %v1313_v39 = vadd.f32 %v1281_v36, %v1245_v11  ;;  %v1147_v28 = vmul.f32 %v3508_v37, %v4189_v12  ;;  %v1386_v46 = vmul.f32 %v3538_v60, %v1346_v20  ;;  %v4268_v19 = vmin.f32 %v1891_v63, 6.0 }
 0x23c   : > { %5018 = vst [vmem:[#allocation45_spill] sm:$0xff] %v4258_v42  ;;  %v1654_v5 = vadd.f32 %v4074_v33, %v1550_v52  ;;  %v1484_v8 = vadd.f32 %v1452_v16, %v1416_v57  ;;  %v4271_v45 = vmul.f32 %v3611_v43, %v1586_v26  ;;  %v4274_v23 = vmul.f32 %v3636_v21, %v1586_v26  ;;  %v1351_v52 = vld [vmem:[#allocation2 + $0x111] sm:$0xff] }
 0x23d   : > { %5019 = vst [vmem:[#allocation46_spill] sm:$0xff] %v4268_v19  ;;  %v1282_v0 = vmul.f32 %v3517_v44, %v1110_v61  ;;  %v1483_v12 = vadd.f32 %v4094_v53, %v1415_v41  ;;  %v1758_v20 = vmul.f32 %v4251_v18, %v1586_v26  ;;  %v1215_v33 = vmul.f32 %v3511_v38, %v4208_v34  ;;  %v1111_v41 = vld [vmem:[#allocation2 + $0x110] sm:$0xff] }
 0x23e   : > { %5020 = vst [vmem:[#allocation47_spill] sm:$0xff] %v4271_v45  ;;  %5021 = vst [vmem:[#allocation48_spill] sm:$0xff] %v4274_v23  ;;  %v1520_v48 = vmul.f32 %v3575_v22, %v1348_v24  ;;  %v4285_v35 = vmul.f32 %v3538_v60, %v1349_v9  ;;  %v4288_v31 = vmul.f32 %v3561_v14, %v1349_v9 }
 0x23f   : > { %v1246_v59 = vadd.f32 %v1214_v55, %v1146_v51  ;;  %v1417_v25 = vadd.f32 %v5023_v17, %v1313_v39  ;;  %5024 = vst [vmem:[#allocation36_spill] sm:$0xff] %v4291_v29  ;;  %v1722_v2 = vadd.f32 %v1690_v58, %v1654_v5  ;;  %v4294_v53 = vmul.f32 %v3575_v22, %v1349_v9  ;;  %v1112_v39 = vld [vmem:[#allocation2 + $0x120] sm:$0xff]  ;;  %v1122_v5 = vld [vmem:[#allocation2 + $0x198] sm:$0xff] }
 0x240   : > { %v4298_v4 = vmul.f32 %v4251_v18, %v4276_v13  ;;  %v1552_v36 = vadd.f32 %v1520_v48, %v1484_v8  ;;  %v1148_v57 = vmul.f32 %v3508_v37, %v4187_v50  ;;  %v1149_v63 = vmul.f32 %v3508_v37, %v4208_v34 }
 0x241   : > { %v4305_v11 = vmul.f32 %v3538_v60, %v1348_v24  ;;  %v1314_v58 = vadd.f32 %v1282_v0, %v1246_v59  ;;  %v4307_v16 = vadd.f32 %v1519_v3, %v1483_v12  ;;  %v1247_v26 = vadd.f32 %v1215_v33, %v1147_v28  ;;  %v1113_v28 = vld [vmem:[#allocation2 + $0x128] sm:$0xff]  ;;  %v1114_v33 = vld [vmem:[#allocation2 + $0x138] sm:$0xff] }
 0x242   : > { %5025 = vst [vmem:[#allocation50_spill] sm:$0xff] %v4298_v4  ;;  %v1454_v51 = vmul.f32 %v3561_v14, %v1348_v24  ;;  %v4312_v55 = vmul.f32 %v3636_v21, %v4291_v29  ;;  %v4314_v50 = vadd.f32 %v1453_v40, %v1417_v25  ;;  %v4318_v34 = vmul.f32 %v4251_v18, %v4291_v29  ;;  %v1123_v24 = vld [vmem:[#allocation2 + $0x1a0] sm:$0xff]  ;;  %v1350_v59 = vld [vmem:[#allocation2 + $0x109] sm:$0xff]  ;;  %v1356_v29 = vld [vmem:[#allocation2 + $0x151] sm:$0xff] }
 0x243   : > { %5026 = vst [vmem:[#allocation51_spill] sm:$0xff] %v4307_v16  ;;  %v4321_v9 = vmul.f32 %v3561_v14, %v1351_v52  ;;  %v4324_v3 = vmul.f32 %v3575_v22, %v1351_v52  ;;  %v4326_v8 = vadd.f32 %v1758_v20, %v1722_v2  ;;  %v4329_v0 = vadd.f32 %v4214_v27, %v1552_v36 }
 0x244   : > { %5027 = vst [vmem:[#allocation52_spill] sm:$0xff] %v4312_v55  ;;  %5028 = vst [vmem:[#allocation53_spill] sm:$0xff] %v4318_v34  ;;  %v1216_v40 = vmul.f32 %v3511_v38, %v1110_v61  ;;  %v1283_v12 = vmul.f32 %v3517_v44, %v1111_v41  ;;  %v1217_v48 = vmul.f32 %v3511_v38, %v1111_v41  ;;  %v1352_v34 = vld [vmem:[#allocation2 + $0x121] sm:$0xff]  ;;  %v4354_v55 = vld [vmem:[#allocation2 + $0x129] sm:$0xff] }
 0x245   : > { %5029 = vst [vmem:[#allocation54_spill] sm:$0xff] %v4324_v3  ;;  %5030 = vst [vmem:[#allocation55_spill] sm:$0xff] %v4326_v8  ;;  %v1418_v17 = vadd.f32 %v1386_v46, %v1314_v58  ;;  %v1218_v25 = vmul.f32 %v3511_v38, %v1112_v39  ;;  %v4336_v62 = vmul.f32 %v3517_v44, %v1122_v5 }
 0x246   : > { %5031 = vst [vmem:[#allocation56_spill] sm:$0xff] %v4329_v0  ;;  %v1150_v20 = vmul.f32 %v3508_v37, %v1110_v61  ;;  %v1219_v27 = vmul.f32 %v3511_v38, %v1113_v28  ;;  %v4341_v2 = vmul.f32 %v3517_v44, %v1123_v24  ;;  %v1391_v36 = vmul.f32 %v3538_v60, %v1351_v52 }
 0x247   : > { %v1151_v15 = vmul.f32 %v3508_v37, %v1111_v41  ;;  %v1284_v42 = vmul.f32 %v3517_v44, %v1112_v39  ;;  %v1285_v46 = vmul.f32 %v3517_v44, %v1113_v28  ;;  %v1286_v58 = vmul.f32 %v3517_v44, %v1114_v33 }
 0x248   : > { %v1248_v19 = vadd.f32 %v1216_v40, %v1148_v57  ;;  %v1315_v5 = vadd.f32 %v1283_v12, %v1247_v26  ;;  %v1390_v1 = vmul.f32 %v3538_v60, %v1350_v59  ;;  %v1287_v61 = vmul.f32 %v3517_v44, %v1115_v56 }
 0x249   : > { %v1249_v4 = vadd.f32 %v1217_v48, %v1149_v63  ;;  %v1486_v8 = vadd.f32 %v1454_v51, %v1418_v17  ;;  %v1250_v24 = vadd.f32 %v1218_v25, %v1150_v20  ;;  %v1220_v52 = vmul.f32 %v3511_v38, %v1114_v33  ;;  %v4357_v63 = vld [vmem:[#allocation2 + $0x139] sm:$0xff]  ;;  %v4364_v25 = vld [vmem:[#allocation2 + $0x141] sm:$0xff] }
 0x24a   : > { %v1456_v41 = vmul.f32 %v3561_v14, %v1350_v59  ;;  %v1522_v47 = vmul.f32 %v3575_v22, %v1350_v59  ;;  %v1221_v18 = vmul.f32 %v3511_v38, %v1115_v56  ;;  %v1251_v54 = vadd.f32 %v1219_v27, %v1151_v15 }
 0x24b   : > { %v1152_v57 = vmul.f32 %v3508_v37, %v1112_v39  ;;  %v1316_v26 = vadd.f32 %v1284_v42, %v1248_v19  ;;  %v1317_v40 = vadd.f32 %v1285_v46, %v1249_v4  ;;  %v1318_v12 = vadd.f32 %v1286_v58, %v1250_v24  ;;  %v1120_v4 = vld [vmem:[#allocation2 + $0x180] sm:$0xff]  ;;  %v1121_v39 = vld [vmem:[#allocation2 + $0x188] sm:$0xff] }
 0x24c   : > { %v1419_v51 = vadd.f32 %v4235_v10, %v1315_v5  ;;  %v4361_v48 = vmul.f32 %v3575_v22, %v1352_v34  ;;  %v1153_v17 = vmul.f32 %v3508_v37, %v1113_v28  ;;  %v1319_v59 = vadd.f32 %v1287_v61, %v1251_v54  ;;  %v1117_v28 = vld [vmem:[#allocation2 + $0x158] sm:$0xff]  ;;  %v1119_v5 = vld [vmem:[#allocation2 + $0x170] sm:$0xff] }
 0x24d   : > { %v4366_v15 = vadd.f32 %v1522_v47, %v1486_v8  ;;  %v1154_v20 = vmul.f32 %v3508_v37, %v1114_v33  ;;  %v1155_v42 = vmul.f32 %v3508_v37, %v1115_v56  ;;  %v1252_v19 = vadd.f32 %v1220_v52, %v1152_v57  ;;  %v1116_v47 = vld [vmem:[#allocation2 + $0x150] sm:$0xff]  ;;  %v1118_v8 = vld [vmem:[#allocation2 + $0x168] sm:$0xff] }
 0x24e   : > { %5032 = vst [vmem:[#allocation57_spill] sm:$0xff] %v4361_v48  ;;  %v1253_v27 = vadd.f32 %v1221_v18, %v1153_v17  ;;  %v1392_v10 = vmul.f32 %v3538_v60, %v1352_v34  ;;  %v4373_v46 = vmul.f32 %v3538_v60, %v4354_v55  ;;  %v4377_v54 = vmul.f32 %v3538_v60, %v4357_v63 }
 0x24f   : > { %5033 = vst [vmem:[#allocation58_spill] sm:$0xff] %v4366_v15  ;;  %v1395_v56 = vmul.f32 %v3538_v60, %v4364_v25  ;;  %v1420_v33 = vadd.f32 %v4305_v11, %v1316_v26  ;;  %v1421_v18 = vadd.f32 %v4285_v35, %v1317_v40  ;;  %v1422_v58 = vadd.f32 %v1390_v1, %v1318_v12 }
 0x250   : > { %v1423_v61 = vadd.f32 %v1391_v36, %v1319_v59  ;;  %v1458_v24 = vmul.f32 %v3561_v14, %v1352_v34  ;;  %v1459_v52 = vmul.f32 %v3561_v14, %v4354_v55  ;;  %v4388_v57 = vmul.f32 %v3561_v14, %v4357_v63 }
 0x251   : > { %v1226_v17 = vmul.f32 %v3511_v38, %v1120_v4  ;;  %v1227_v32 = vmul.f32 %v3511_v38, %v1121_v39  ;;  %v4394_v11 = vmul.f32 %v3561_v14, %v4364_v25  ;;  %v4397_v1 = vadd.f32 %v4288_v31, %v1419_v51 }
 0x252   : > { %v1156_v35 = vmul.f32 %v3508_v37, %v1116_v47  ;;  %v1222_v34 = vmul.f32 %v3511_v38, %v1116_v47  ;;  %v1223_v36 = vmul.f32 %v3511_v38, %v1117_v28  ;;  %v1224_v26 = vmul.f32 %v3511_v38, %v1118_v8 }
 0x253   : > { %5034 = vst [vmem:[#allocation59_spill] sm:$0xff] %v4397_v1  ;;  %v1158_v40 = vmul.f32 %v3508_v37, %v1118_v8  ;;  %v1159_v12 = vmul.f32 %v3508_v37, %v1119_v5  ;;  %v1225_v59 = vmul.f32 %v3511_v38, %v1119_v5  ;;  %v1288_v23 = vmul.f32 %v3517_v44, %v1116_v47  ;;  %v1357_v38 = vld [vmem:[#allocation2 + $0x159] sm:$0xff] }
 0x254   : > { %v1289_v0 = vmul.f32 %v3517_v44, %v1117_v28  ;;  %v1290_v31 = vmul.f32 %v3517_v44, %v1118_v8  ;;  %v1291_v51 = vmul.f32 %v3517_v44, %v1119_v5  ;;  %v1292_v6 = vmul.f32 %v3517_v44, %v1120_v4 }
 0x255   : > { %v1157_v30 = vmul.f32 %v3508_v37, %v1117_v28  ;;  %v1258_v49 = vadd.f32 %v1226_v17, %v1158_v40  ;;  %v1259_v21 = vadd.f32 %v1227_v32, %v1159_v12  ;;  %v1293_v7 = vmul.f32 %v3517_v44, %v1121_v39  ;;  %v1358_v37 = vld [vmem:[#allocation2 + $0x169] sm:$0xff]  ;;  %v1359_v28 = vld [vmem:[#allocation2 + $0x171] sm:$0xff] }
 0x256   : > { %v1254_v45 = vadd.f32 %v1222_v34, %v1154_v20  ;;  %v1255_v15 = vadd.f32 %v1223_v36, %v1155_v42  ;;  %v1256_v16 = vadd.f32 %v1224_v26, %v1156_v35  ;;  %v1488_v13 = vadd.f32 %v1456_v41, %v1420_v33  ;;  %v5036_v12 = vld [vmem:[#allocation54_spill] sm:$0xff] }
 0x257   : > { %v1257_v47 = vadd.f32 %v1225_v59, %v1157_v30  ;;  %v1320_v43 = vadd.f32 %v1288_v23, %v1252_v19  ;;  %v1489_v8 = vadd.f32 %v4321_v9, %v1421_v18  ;;  %v1490_v48 = vadd.f32 %v1458_v24, %v1422_v58  ;;  %v1363_v18 = vld [vmem:[#allocation2 + $0x1a1] sm:$0xff] }
 0x258   : > { %v1321_v5 = vadd.f32 %v1289_v0, %v1253_v27  ;;  %v1322_v3 = vadd.f32 %v1290_v31, %v1254_v45  ;;  %v1323_v4 = vadd.f32 %v1291_v51, %v1255_v15  ;;  %v1324_v1 = vadd.f32 %v1292_v6, %v1256_v16  ;;  %v1362_v45 = vld [vmem:[#allocation2 + $0x199] sm:$0xff]  ;;  %v5037_v31 = vld [vmem:[#allocation57_spill] sm:$0xff] }
 0x259   : > { %v1325_v32 = vadd.f32 %v1293_v7, %v1257_v47  ;;  %v1326_v44 = vadd.f32 %v4336_v62, %v1258_v49  ;;  %v1327_v20 = vadd.f32 %v4341_v2, %v1259_v21  ;;  %v1397_v42 = vmul.f32 %v3538_v60, %v1357_v38  ;;  %v1360_v21 = vld [vmem:[#allocation2 + $0x181] sm:$0xff]  ;;  %v1361_v49 = vld [vmem:[#allocation2 + $0x189] sm:$0xff] }
 0x25a   : > { %v1396_v30 = vmul.f32 %v3538_v60, %v1356_v29  ;;  %v1463_v23 = vmul.f32 %v3561_v14, %v1357_v38  ;;  %v1491_v41 = vadd.f32 %v1459_v52, %v1423_v61  ;;  %v1525_v9 = vmul.f32 %v3575_v22, %v4354_v55  ;;  %v5035_v40 = vld [vmem:[#allocation59_spill] sm:$0xff] }
 0x25b   : > { %v1398_v6 = vmul.f32 %v3538_v60, %v1358_v37  ;;  %v1399_v16 = vmul.f32 %v3538_v60, %v1359_v28  ;;  %v1424_v7 = vadd.f32 %v1392_v10, %v1320_v43  ;;  %v1526_v62 = vmul.f32 %v3575_v22, %v4357_v63 }
 0x25c   : > { %v1425_v0 = vadd.f32 %v4373_v46, %v1321_v5  ;;  %v1426_v2 = vadd.f32 %v4377_v54, %v1322_v3  ;;  %v1427_v15 = vadd.f32 %v1395_v56, %v1323_v4  ;;  %v1428_v19 = vadd.f32 %v1396_v30, %v1324_v1 }
 0x25d   : > { %v1429_v39 = vadd.f32 %v1397_v42, %v1325_v32  ;;  %v1430_v27 = vadd.f32 %v1398_v6, %v1326_v44  ;;  %v1431_v55 = vadd.f32 %v1399_v16, %v1327_v20  ;;  %v1527_v33 = vmul.f32 %v3575_v22, %v4364_v25  ;;  %v4455_v32 = vld [vmem:[#allocation2 + $0x12a] sm:$0xff]  ;;  %v4457_v20 = vld [vmem:[#allocation2 + $0x13a] sm:$0xff]  ;;  %v4459_v42 = vld [vmem:[#allocation2 + $0x142] sm:$0xff] }
 0x25e   : > { %v1462_v60 = vmul.f32 %v3561_v14, %v1356_v29  ;;  %v1464_v43 = vmul.f32 %v3561_v14, %v1358_v37  ;;  %v1529_v63 = vmul.f32 %v3575_v22, %v1357_v38  ;;  %v1534_v10 = vmul.f32 %v3575_v22, %v1362_v45  ;;  %v4449_v38 = vld [vmem:[#allocation2 + $0x112] sm:$0xff]  ;;  %v5038_v45 = vld [vmem:[#allocation36_spill] sm:$0xff] }
 0x25f   : > { %v1465_v46 = vmul.f32 %v3561_v14, %v1359_v28  ;;  %v1466_v3 = vmul.f32 %v3561_v14, %v1360_v21  ;;  %v1467_v54 = vmul.f32 %v3561_v14, %v1361_v49  ;;  %v1492_v56 = vadd.f32 %v4388_v57, %v1424_v7  ;;  %v5039_v6 = vld [vmem:[#allocation18_spill] sm:$0xff]  ;;  %v5040_v7 = vld [vmem:[#allocation49_spill] sm:$0xff] }
 0x260   : > { %v1493_v58 = vadd.f32 %v4394_v11, %v1425_v0  ;;  %v1494_v25 = vadd.f32 %v1462_v60, %v1426_v2  ;;  %v1495_v61 = vadd.f32 %v1463_v23, %v1427_v15  ;;  %v1496_v24 = vadd.f32 %v1464_v43, %v1428_v19  ;;  %v5041_v60 = vld [vmem:[#allocation51_spill] sm:$0xff]  ;;  %v5042_v43 = vld [vmem:[#allocation32_spill] sm:$0xff] }
 0x261   : > { %v1497_v52 = vadd.f32 %v1465_v46, %v1429_v39  ;;  %v1498_v17 = vadd.f32 %v1466_v3, %v1430_v27  ;;  %v1499_v1 = vadd.f32 %v1467_v54, %v1431_v55  ;;  %v1528_v35 = vmul.f32 %v3575_v22, %v1356_v29  ;;  %v4451_v29 = vld [vmem:[#allocation2 + $0x10a] sm:$0xff]  ;;  %v5045_v3 = vld [vmem:[#allocation47_spill] sm:$0xff] }
 0x262   : > { %v1530_v34 = vmul.f32 %v3575_v22, %v1358_v37  ;;  %v1531_v36 = vmul.f32 %v3575_v22, %v1359_v28  ;;  %v1532_v26 = vmul.f32 %v3575_v22, %v1360_v21  ;;  %v1535_v14 = vmul.f32 %v3575_v22, %v1363_v18  ;;  %v4453_v28 = vld [vmem:[#allocation2 + $0x122] sm:$0xff]  ;;  %v5044_v46 = vld [vmem:[#allocation58_spill] sm:$0xff] }
 0x263   : > { %v1533_v57 = vmul.f32 %v3575_v22, %v1361_v49  ;;  %v1553_v11 = vadd.f32 %v4294_v53, %v4314_v50  ;;  %v1555_v59 = vadd.f32 %v5036_v12, %v5035_v40  ;;  %v1556_v51 = vadd.f32 %v5037_v31, %v1488_v13  ;;  %v4461_v13 = vld [vmem:[#allocation2 + $0x152] sm:$0xff]  ;;  %v1600_v12 = vld [vmem:[#allocation2 + $0x182] sm:$0xff]  ;;  %v4501_v31 = vld [vmem:[#allocation2 + $0x18a] sm:$0xff] }
 0x264   : > { %v1557_v47 = vadd.f32 %v1525_v9, %v1489_v8  ;;  %v1558_v5 = vadd.f32 %v1526_v62, %v1490_v48  ;;  %v1559_v4 = vadd.f32 %v1527_v33, %v1491_v41  ;;  %v1560_v37 = vadd.f32 %v1528_v35, %v1492_v56  ;;  %v4463_v48 = vld [vmem:[#allocation2 + $0x15a] sm:$0xff]  ;;  %v4465_v41 = vld [vmem:[#allocation2 + $0x16a] sm:$0xff]  ;;  %v4467_v9 = vld [vmem:[#allocation2 + $0x172] sm:$0xff] }
 0x265   : > { %v1561_v22 = vadd.f32 %v1529_v63, %v1493_v58  ;;  %v1562_v44 = vadd.f32 %v1530_v34, %v1494_v25  ;;  %v1563_v53 = vadd.f32 %v1531_v36, %v1495_v61  ;;  %v1564_v50 = vadd.f32 %v1532_v26, %v1496_v24  ;;  %v5046_v56 = vld [vmem:[#allocation41_spill] sm:$0xff]  ;;  %v5047_v40 = vld [vmem:[#allocation19_spill] sm:$0xff] }
 0x266   : > { %v1565_v30 = vadd.f32 %v1533_v57, %v1497_v52  ;;  %v1566_v23 = vadd.f32 %v1534_v10, %v1498_v17  ;;  %v1567_v8 = vadd.f32 %v1535_v14, %v1499_v1  ;;  %v1628_v16 = vmul.f32 %v5039_v6, %v5038_v45  ;;  %v5043_v10 = vld [vmem:[#allocation37_spill] sm:$0xff]  ;;  %v5051_v45 = vld [vmem:[#allocation34_spill] sm:$0xff] }
 0x267   : > { %v1629_v62 = vmul.f32 %v5039_v6, %v5040_v7  ;;  %v1630_v21 = vmul.f32 %v5039_v6, %v4451_v29  ;;  %v1631_v49 = vmul.f32 %v5039_v6, %v4449_v38  ;;  %v1632_v0 = vmul.f32 %v5039_v6, %v4453_v28 }
 0x268   : > { %v1633_v2 = vmul.f32 %v5039_v6, %v4455_v32  ;;  %v1634_v15 = vmul.f32 %v5039_v6, %v4457_v20  ;;  %v1635_v19 = vmul.f32 %v5039_v6, %v4459_v42  ;;  %v1636_v39 = vmul.f32 %v5039_v6, %v4461_v13 }
 0x269   : > { %v1637_v27 = vmul.f32 %v5039_v6, %v4463_v48  ;;  %v1638_v55 = vmul.f32 %v5039_v6, %v4465_v41  ;;  %v1639_v33 = vmul.f32 %v5039_v6, %v4467_v9  ;;  %v1655_v63 = vadd.f32 %v5042_v43, %v5041_v60  ;;  %v5057_v60 = vld [vmem:[#allocation52_spill] sm:$0xff] }
 0x26a   : > { %v1657_v18 = vadd.f32 %v5043_v10, %v1553_v11  ;;  %v1658_v54 = vadd.f32 %v5045_v3, %v5044_v46  ;;  %v1659_v58 = vadd.f32 %v5046_v56, %v1555_v59  ;;  %v1660_v25 = vadd.f32 %v1628_v16, %v1556_v51  ;;  %v4525_v16 = vld [vmem:[#allocation3] ss:$0 sm:$0xff] }
 0x26b   : > { %v1661_v61 = vadd.f32 %v1629_v62, %v1557_v47  ;;  %v1662_v24 = vadd.f32 %v1630_v21, %v1558_v5  ;;  %v1663_v52 = vadd.f32 %v1631_v49, %v1559_v4  ;;  %v1664_v17 = vadd.f32 %v1632_v0, %v1560_v37 }
 0x26c   : > { %v1665_v1 = vadd.f32 %v1633_v2, %v1561_v22  ;;  %v1666_v35 = vadd.f32 %v1634_v15, %v1562_v44  ;;  %v1667_v34 = vadd.f32 %v1635_v19, %v1563_v53  ;;  %v1668_v36 = vadd.f32 %v1636_v39, %v1564_v50  ;;  %v5048_v44 = vld [vmem:[#allocation26_spill] sm:$0xff]  ;;  %v5049_v53 = vld [vmem:[#allocation33_spill] sm:$0xff]  ;;  %v5054_v19 = vld [vmem:[#allocation56_spill] sm:$0xff] }
 0x26d   : > { %v1669_v26 = vadd.f32 %v1637_v27, %v1565_v30  ;;  %v1670_v14 = vadd.f32 %v1638_v55, %v1566_v23  ;;  %v1671_v57 = vadd.f32 %v1639_v33, %v1567_v8  ;;  %v1695_v11 = vmul.f32 %v5047_v40, %v5040_v7  ;;  %v5050_v8 = vld [vmem:[#allocation27_spill] sm:$0xff]  ;;  %v5053_v2 = vld [vmem:[#allocation38_spill] sm:$0xff]  ;;  %v5055_v39 = vld [vmem:[#allocation48_spill] sm:$0xff] }
 0x26e   : > { %v1696_v59 = vmul.f32 %v5047_v40, %v4451_v29  ;;  %v1697_v51 = vmul.f32 %v5047_v40, %v4449_v38  ;;  %v1698_v47 = vmul.f32 %v5047_v40, %v4453_v28  ;;  %v1699_v5 = vmul.f32 %v5047_v40, %v4455_v32  ;;  %v5052_v7 = vld [vmem:[#allocation31_spill] sm:$0xff]  ;;  %v5056_v55 = vld [vmem:[#allocation42_spill] sm:$0xff] }
 0x26f   : > { %v1700_v4 = vmul.f32 %v5047_v40, %v4457_v20  ;;  %v1701_v37 = vmul.f32 %v5047_v40, %v4459_v42  ;;  %v1702_v22 = vmul.f32 %v5047_v40, %v4461_v13  ;;  %v1721_v50 = vadd.f32 %v5049_v53, %v5048_v44  ;;  %v5058_v44 = vld [vmem:[#allocation39_spill] sm:$0xff] }
 0x270   : > { %v1703_v30 = vmul.f32 %v5047_v40, %v4463_v48  ;;  %v1704_v23 = vmul.f32 %v5047_v40, %v4465_v41  ;;  %v1787_v6 = vadd.f32 %v5051_v45, %v5050_v8  ;;  %v4529_v62 = vadd.f32 %v4525_v16, %v5052_v7 }
 0x271   : > { %v1705_v21 = vmul.f32 %v5047_v40, %v4467_v9  ;;  %v1706_v49 = vmul.f32 %v5047_v40, %v1600_v12  ;;  %v1707_v0 = vmul.f32 %v5047_v40, %v4501_v31  ;;  %v1723_v15 = vadd.f32 %v5053_v2, %v1655_v63 }
 0x272   : > { %v1724_v27 = vadd.f32 %v5055_v39, %v5054_v19  ;;  %v1725_v33 = vadd.f32 %v5056_v55, %v1657_v18  ;;  %v1726_v43 = vadd.f32 %v5057_v60, %v1658_v54  ;;  %v1727_v10 = vadd.f32 %v1695_v11, %v1659_v58  ;;  %v5059_v58 = vld [vmem:[#allocation43_spill] sm:$0xff] }
 0x273   : > { %v1728_v46 = vadd.f32 %v1696_v59, %v1660_v25  ;;  %v1729_v3 = vadd.f32 %v1697_v51, %v1661_v61  ;;  %v1730_v56 = vadd.f32 %v1698_v47, %v1662_v24  ;;  %v1789_v53 = vadd.f32 %v5058_v44, %v1721_v50  ;;  %v5060_v61 = vld [vmem:[#allocation44_spill] sm:$0xff]  ;;  %v5062_v59 = vld [vmem:[#allocation55_spill] sm:$0xff] }
 0x274   : > { %v1731_v8 = vadd.f32 %v1699_v5, %v1663_v52  ;;  %v1732_v45 = vadd.f32 %v1700_v4, %v1664_v17  ;;  %v4543_v7 = vadd.f32 %v4525_v16, %v1787_v6  ;;  %v1856_v63 = vadd.f32 3.0, %v4529_v62  ;;  %v5061_v52 = vld [vmem:[#allocation53_spill] sm:$0xff]  ;;  %v1602_v47 = vld [vmem:[#allocation2 + $0x19a] sm:$0xff]  ;;  %v5063_v4 = vld [vmem:[#allocation50_spill] sm:$0xff] }
 0x275   : > { %v1733_v40 = vadd.f32 %v1701_v37, %v1665_v1  ;;  %v1734_v2 = vadd.f32 %v1702_v22, %v1666_v35  ;;  %v1735_v19 = vadd.f32 %v1703_v30, %v1667_v34  ;;  %v1736_v39 = vadd.f32 %v1704_v23, %v1668_v36 }
 0x276   : > { %v1737_v18 = vadd.f32 %v1705_v21, %v1669_v26  ;;  %v1738_v55 = vadd.f32 %v1706_v49, %v1670_v14  ;;  %v4546_v54 = vadd.f32 %v1707_v0, %v1671_v57  ;;  %v1762_v25 = vmul.f32 %v5059_v58, %v4451_v29 }
 0x277   : > { %v1791_v24 = vadd.f32 %v5060_v61, %v1723_v15  ;;  %v1792_v17 = vadd.f32 %v5061_v52, %v1724_v27  ;;  %v4553_v11 = vadd.f32 %v4525_v16, %v1789_v53  ;;  %v4557_v1 = vadd.f32 %v4525_v16, %v5062_v59 }
 0x278   : > { %v1763_v35 = vmul.f32 %v5059_v58, %v4449_v38  ;;  %v1764_v34 = vmul.f32 %v5059_v58, %v4453_v28  ;;  %v1858_v36 = vadd.f32 3.0, %v4543_v7  ;;  %v1888_v29 = vmax.f32 %v1856_v63, 0.0  ;;  %v1603_v38 = vld [vmem:[#allocation2 + $0x1a2] sm:$0xff] }
 0x279   : > { %v1765_v26 = vmul.f32 %v5059_v58, %v4455_v32  ;;  %v1766_v14 = vmul.f32 %v5059_v58, %v4457_v20  ;;  %v1767_v57 = vmul.f32 %v5059_v58, %v4459_v42  ;;  %v1768_v51 = vmul.f32 %v5059_v58, %v4461_v13 }
 0x27a   : > { %v1769_v28 = vmul.f32 %v5059_v58, %v4463_v48  ;;  %v1770_v5 = vmul.f32 %v5059_v58, %v4465_v41  ;;  %v1793_v37 = vadd.f32 %v5063_v4, %v1725_v33  ;;  %v1794_v32 = vadd.f32 %v1762_v25, %v1726_v43  ;;  %v5066_v4 = vld [vmem:[#allocation45_spill] sm:$0xff] }
 0x27b   : > { %v4578_v22 = vadd.f32 %v4525_v16, %v1791_v24  ;;  %v4581_v20 = vadd.f32 %v4525_v16, %v1792_v17  ;;  %v1860_v42 = vadd.f32 3.0, %v4553_v11  ;;  %v1861_v13 = vadd.f32 3.0, %v4557_v1 }
 0x27c   : > { %v1771_v50 = vmul.f32 %v5059_v58, %v4467_v9  ;;  %v1772_v48 = vmul.f32 %v5059_v58, %v1600_v12  ;;  %v1890_v30 = vmax.f32 %v1858_v36, 0.0  ;;  %v1920_v41 = vmin.f32 %v1888_v29, 6.0 }
 0x27d   : > { %v1773_v23 = vmul.f32 %v5059_v58, %v4501_v31  ;;  %v1774_v6 = vmul.f32 %v5059_v58, %v1602_v47  ;;  %v4592_v21 = vmul.f32 %v5059_v58, %v1603_v38  ;;  %v1795_v49 = vadd.f32 %v1763_v35, %v1727_v10 }
 0x27e   : > { %v1796_v0 = vadd.f32 %v1764_v34, %v1728_v46  ;;  %v1797_v15 = vadd.f32 %v1765_v26, %v1729_v3  ;;  %v4595_v27 = vadd.f32 %v4525_v16, %v1793_v37  ;;  %v4598_v9 = vadd.f32 %v4525_v16, %v1794_v32 }
 0x27f   : > { %v1862_v12 = vadd.f32 3.0, %v4578_v22  ;;  %v1863_v33 = vadd.f32 3.0, %v4581_v20  ;;  %v1892_v60 = vmax.f32 %v1860_v42, 0.0  ;;  %v1893_v31 = vmax.f32 %v1861_v13, 0.0  ;;  %v5067_v13 = vld [vmem:[#allocation40_spill] sm:$0xff] }
 0x280   : > { %v1798_v43 = vadd.f32 %v1766_v14, %v1730_v56  ;;  %v1799_v44 = vadd.f32 %v1767_v57, %v1731_v8  ;;  %v1922_v53 = vmin.f32 %v1890_v30, 6.0  ;;  %v1952_v63 = vmul.f32 %v1920_v41, %v4529_v62 }
 0x281   : > { %v1800_v10 = vadd.f32 %v1768_v51, %v1732_v45  ;;  %v1801_v46 = vadd.f32 %v1769_v28, %v1733_v40  ;;  %v1802_v3 = vadd.f32 %v1770_v5, %v1734_v2  ;;  %v1803_v58 = vadd.f32 %v1771_v50, %v1735_v19  ;;  %v5064_v45 = vld [vmem:[#allocation24_spill] sm:$0xff]  ;;  %v5065_v40 = vld [vmem:[#allocation46_spill] sm:$0xff] }
 0x282   : > { %v4604_v25 = vadd.f32 %v4525_v16, %v1795_v49  ;;  %v4607_v61 = vadd.f32 %v4525_v16, %v1796_v0  ;;  %v1864_v24 = vadd.f32 3.0, %v4595_v27  ;;  %v1865_v52 = vadd.f32 3.0, %v4598_v9 }
 0x283   : > { %v1894_v17 = vmax.f32 %v1862_v12, 0.0  ;;  %v1895_v56 = vmax.f32 %v1863_v33, 0.0  ;;  %v1924_v8 = vmin.f32 %v1892_v60, 6.0  ;;  %v1925_v59 = vmin.f32 %v1893_v31, 6.0 }
 0x284   : > { %v1804_v35 = vadd.f32 %v1772_v48, %v1736_v39  ;;  %v1954_v62 = vmul.f32 %v1922_v53, %v4543_v7  ;;  %v1955_v2 = vmul.f32 %v5065_v40, %v5064_v45  ;;  %v4614_v19 = vmul.f32 0.16666667, %v1952_v63 }
 0x285   : > { %v4616_v34 = vadd.f32 %v1773_v23, %v1737_v18  ;;  %v4618_v36 = vadd.f32 %v1774_v6, %v1738_v55  ;;  %v4621_v29 = vadd.f32 %v4525_v16, %v1797_v15  ;;  %v4624_v26 = vadd.f32 %v4525_v16, %v1798_v43 }
 0x286   : > { %v1866_v14 = vadd.f32 3.0, %v4604_v25  ;;  %v1867_v39 = vadd.f32 3.0, %v4607_v61  ;;  %v1896_v7 = vmax.f32 %v1864_v24, 0.0  ;;  %v1897_v57 = vmax.f32 %v1865_v52, 0.0 }
 0x287   : > { %v1926_v51 = vmin.f32 %v1894_v17, 6.0  ;;  %v1927_v47 = vmin.f32 %v1895_v56, 6.0  ;;  %v1956_v38 = vmul.f32 %v1924_v8, %v4553_v11  ;;  %v1957_v18 = vmul.f32 %v1925_v59, %v4557_v1 }
 0x288   : > { %v4630_v55 = vmul.f32 0.16666667, %v1954_v62  ;;  %v4632_v28 = vmul.f32 0.16666667, %v1955_v2  ;;  %v2024_v5 = vsel %vm997_vm1, %v4614_v19, 0.0  ;;  %v2026_v37 = vsel %vm997_vm1, %v5066_v4, 0.0 }
 0x289   : > { %v4639_v32 = vadd.f32 %v4525_v16, %v1799_v44  ;;  %v4642_v42 = vadd.f32 %v4525_v16, %v1800_v10  ;;  %v1868_v11 = vadd.f32 3.0, %v4621_v29  ;;  %v2025_v1 = vadd.f32 %v2024_v5, %v5067_v13 }
 0x28a   : > { %v1869_v50 = vadd.f32 3.0, %v4624_v26  ;;  %v1898_v48 = vmax.f32 %v1866_v14, 0.0  ;;  %v1899_v30 = vmax.f32 %v1867_v39, 0.0  ;;  %v1928_v41 = vmin.f32 %v1896_v7, 6.0 }
 0x28b   : > { %v1929_v23 = vmin.f32 %v1897_v57, 6.0  ;;  %v1958_v6 = vmul.f32 %v1926_v51, %v4578_v22  ;;  %v1959_v49 = vmul.f32 %v1927_v47, %v4581_v20  ;;  %v2027_v0 = vadd.f32 %v2026_v37, %v2025_v1 }
 0x28c   : > { %v4649_v15 = vmul.f32 0.16666667, %v1956_v38  ;;  %v4651_v12 = vmul.f32 0.16666667, %v1957_v18  ;;  %v2028_v33 = vsel %vm997_vm1, %v4630_v55, 0.0  ;;  %v2030_v60 = vsel %vm997_vm1, %v4632_v28, 0.0 }
 0x28d   : > { %v4658_v31 = vadd.f32 %v4525_v16, %v1801_v46  ;;  %v4661_v43 = vadd.f32 %v4525_v16, %v1802_v3  ;;  %v1870_v22 = vadd.f32 3.0, %v4639_v32  ;;  %v2029_v20 = vadd.f32 %v2028_v33, %v2027_v0 }
 0x28e   : > { %v1871_v44 = vadd.f32 3.0, %v4642_v42  ;;  %v1900_v53 = vmax.f32 %v1868_v11, 0.0  ;;  %v1901_v63 = vmax.f32 %v1869_v50, 0.0  ;;  %v1930_v10 = vmin.f32 %v1898_v48, 6.0 }
 0x28f   : > { %v1931_v24 = vmin.f32 %v1899_v30, 6.0  ;;  %v1960_v52 = vmul.f32 %v1928_v41, %v4595_v27  ;;  %v1961_v17 = vmul.f32 %v1929_v23, %v4598_v9  ;;  %v2031_v56 = vadd.f32 %v2030_v60, %v2029_v20 }
 0x290   : > { %v4667_v8 = vmul.f32 0.16666667, %v1958_v6  ;;  %v4669_v46 = vmul.f32 0.16666667, %v1959_v49  ;;  %v2032_v3 = vsel %vm997_vm1, %v4649_v15, 0.0  ;;  %v2034_v59 = vsel %vm997_vm1, %v4651_v12, 0.0 }
 0x291   : > { %v4676_v62 = vadd.f32 %v4525_v16, %v1803_v58  ;;  %v4679_v45 = vadd.f32 %v4525_v16, %v1804_v35  ;;  %v1872_v27 = vadd.f32 3.0, %v4658_v31  ;;  %v2033_v9 = vadd.f32 %v2032_v3, %v2031_v56 }
 0x292   : > { %v1873_v40 = vadd.f32 3.0, %v4661_v43  ;;  %v1902_v2 = vmax.f32 %v1870_v22, 0.0  ;;  %v1903_v14 = vmax.f32 %v1871_v44, 0.0  ;;  %v1932_v39 = vmin.f32 %v1900_v53, 6.0 }
 0x293   : > { %v1933_v7 = vmin.f32 %v1901_v63, 6.0  ;;  %v1962_v57 = vmul.f32 %v1930_v10, %v4604_v25  ;;  %v1963_v51 = vmul.f32 %v1931_v24, %v4607_v61  ;;  %v2035_v47 = vadd.f32 %v2034_v59, %v2033_v9 }
 0x294   : > { %v4685_v38 = vmul.f32 0.16666667, %v1960_v52  ;;  %v4687_v58 = vmul.f32 0.16666667, %v1961_v17  ;;  %v2036_v35 = vsel %vm997_vm1, %v4667_v8, 0.0  ;;  %v2038_v18 = vsel %vm997_vm1, %v4669_v46, 0.0 }
 0x295   : > { %v1807_v5 = vadd.f32 %v4592_v21, %v4546_v54  ;;  %v1844_v37 = vadd.f32 %v4525_v16, %v4616_v34  ;;  %v1874_v25 = vadd.f32 3.0, %v4676_v62  ;;  %v2037_v61 = vadd.f32 %v2036_v35, %v2035_v47 }
 0x296   : > { %v1875_v11 = vadd.f32 3.0, %v4679_v45  ;;  %v1904_v13 = vmax.f32 %v1872_v27, 0.0  ;;  %v1905_v1 = vmax.f32 %v1873_v40, 0.0  ;;  %v1934_v50 = vmin.f32 %v1902_v2, 6.0 }
 0x297   : > { %v1935_v48 = vmin.f32 %v1903_v14, 6.0  ;;  %v1964_v30 = vmul.f32 %v1932_v39, %v4621_v29  ;;  %v1965_v41 = vmul.f32 %v1933_v7, %v4624_v26  ;;  %v2039_v23 = vadd.f32 %v2038_v18, %v2037_v61 }
 0x298   : > { %v4701_v6 = vmul.f32 0.16666667, %v1962_v57  ;;  %v4703_v54 = vmul.f32 0.16666667, %v1963_v51  ;;  %v2040_v21 = vsel %vm997_vm1, %v4685_v38, 0.0  ;;  %v2042_v34 = vsel %vm997_vm1, %v4687_v58, 0.0 }
 0x299   : > { %v1845_v49 = vadd.f32 %v4525_v16, %v4618_v36  ;;  %v1846_v0 = vadd.f32 %v4525_v16, %v1807_v5  ;;  %v2041_v33 = vadd.f32 %v2040_v21, %v2039_v23  ;;  %v1876_v29 = vadd.f32 3.0, %v1844_v37 }
 0x29a   : > { %v1906_v60 = vmax.f32 %v1874_v25, 0.0  ;;  %v1907_v26 = vmax.f32 %v1875_v11, 0.0  ;;  %v1936_v22 = vmin.f32 %v1904_v13, 6.0  ;;  %v1937_v20 = vmin.f32 %v1905_v1, 6.0 }
 0x29b   : > { %v1966_v44 = vmul.f32 %v1934_v50, %v4639_v32  ;;  %v1967_v53 = vmul.f32 %v1935_v48, %v4642_v42  ;;  %v2043_v63 = vadd.f32 %v2042_v34, %v2041_v33  ;;  %v4714_v10 = vmul.f32 0.16666667, %v1964_v30 }
 0x29c   : > { %v4716_v24 = vmul.f32 0.16666667, %v1965_v41  ;;  %v2044_v36 = vsel %vm997_vm1, %v4701_v6, 0.0  ;;  %v2046_v16 = vsel %vm997_vm1, %v4703_v54, 0.0  ;;  %v1877_v17 = vadd.f32 3.0, %v1845_v49 }
 0x29d   : > { %v2045_v52 = vadd.f32 %v2044_v36, %v2043_v63  ;;  %v1878_v56 = vadd.f32 3.0, %v1846_v0  ;;  %v1908_v3 = vmax.f32 %v1876_v29, 0.0  ;;  %v1938_v59 = vmin.f32 %v1906_v60, 6.0 }
 0x29e   : > { %v1939_v27 = vmin.f32 %v1907_v26, 6.0  ;;  %v1968_v32 = vmul.f32 %v1936_v22, %v4658_v31  ;;  %v1969_v42 = vmul.f32 %v1937_v20, %v4661_v43  ;;  %v4724_v40 = vmul.f32 0.16666667, %v1966_v44 }
 0x29f   : > { %v2047_v9 = vadd.f32 %v2046_v16, %v2045_v52  ;;  %v4726_v2 = vmul.f32 0.16666667, %v1967_v53  ;;  %v2048_v14 = vsel %vm997_vm1, %v4714_v10, 0.0  ;;  %v2050_v39 = vsel %vm997_vm1, %v4716_v24, 0.0 }
 0x2a0   : > { %v1909_v57 = vmax.f32 %v1877_v17, 0.0  ;;  %v1910_v51 = vmax.f32 %v1878_v56, 0.0  ;;  %v1940_v47 = vmin.f32 %v1908_v3, 6.0  ;;  %v1970_v35 = vmul.f32 %v1938_v59, %v4676_v62 }
 0x2a1   : > { %v2049_v7 = vadd.f32 %v2048_v14, %v2047_v9  ;;  %v1971_v31 = vmul.f32 %v1939_v27, %v4679_v45  ;;  %v4734_v18 = vmul.f32 0.16666667, %v1968_v32  ;;  %v4736_v5 = vmul.f32 0.16666667, %v1969_v42  ;;  %v2162_v9 = vld [vmem:[#allocation8 + $0x8] sm:$0xff]  ;;  %v2161_v14 = vld [vmem:[#allocation8] sm:$0xff] }
 0x2a2   : > { %v2052_v25 = vsel %vm997_vm1, %v4724_v40, 0.0  ;;  %v2054_v61 = vsel %vm997_vm1, %v4726_v2, 0.0  ;;  %v1941_v13 = vmin.f32 %v1909_v57, 6.0  ;;  %v1942_v1 = vmin.f32 %v1910_v51, 6.0 }
 0x2a3   : > { %v2051_v43 = vadd.f32 %v2050_v39, %v2049_v7  ;;  %v1972_v50 = vmul.f32 %v1940_v47, %v1844_v37  ;;  %v4742_v30 = vmul.f32 0.16666667, %v1970_v35  ;;  %v4744_v62 = vmul.f32 0.16666667, %v1971_v31  ;;  %v2086_v39 = vld [vmem:[#allocation6] sm:$0x1] }
 0x2a4   : > { %v2056_v45 = vsel %vm997_vm1, %v4734_v18, 0.0  ;;  %v2058_v41 = vsel %vm997_vm1, %v4736_v5, 0.0  ;;  %v1973_v21 = vmul.f32 %v1941_v13, %v1845_v49  ;;  %v1974_v33 = vmul.f32 %v1942_v1, %v1846_v0  ;;  %v4765_v35 = vld [vmem:[%s4941_s9] sm:$0xff] }
 0x2a5   : > { %v2053_v11 = vadd.f32 %v2052_v25, %v2051_v43  ;;  %v2004_v29 = vmul.f32 0.16666667, %v1972_v50  ;;  %v2060_v60 = vsel %vm997_vm1, %v4742_v30, 0.0  ;;  %v2062_v37 = vsel %vm997_vm1, %v4744_v62, 0.0  ;;  %2766 = vmatprep.mubr.msk.f32.mxu0 %vm997_vm1, %v4765_v35  ;;  %v2279_v31 = vld [vmem:[%s4942_s10] sm:$0xff]  ;;  %v2280_v43 = vld [vmem:[%s4942_s10 + $0x8] sm:$0xff] }
 0x2a6   : > { %v2005_v22 = vmul.f32 0.16666667, %v1973_v21  ;;  %v2006_v44 = vmul.f32 0.16666667, %v1974_v33  ;;  %v5068_v42 = vmov 0.0   ;;  %v3130_v25 = vmov 0  }
 0x2a7   : > { %v2055_v48 = vadd.f32 %v2054_v61, %v2053_v11  ;;  %v2064_v53 = vsel %vm997_vm1, %v2004_v29, 0.0  ;;  %2935 = vset.pattern.permute.xlu0 %v3130_v25  ;;  %2936 = vset.pattern.permute.xlu1 %v3130_v25  ;;  %v2163_v61 = vld [vmem:[#allocation9] sm:$0x1] }
 0x2a8   : > { %v2066_v36 = vsel %vm997_vm1, %v2005_v22, 0.0  ;;  %v2068_v49 = vsel %vm997_vm1, %v2006_v44, 0.0  ;;  %2283 = vperm.xlu0 %2935, %v2279_v31   ;;  %2288 = vperm.xlu1 %2936, %v2280_v43  }
 0x2a9   : > { %v2057_v23 = vadd.f32 %v2056_v45, %v2055_v48 }
 0x2ab   : > { %v2059_v34 = vadd.f32 %v2058_v41, %v2057_v23  ;;  %v5069_v23 = vld [vmem:[#allocation17_spill] sm:$0xff] }
 0x2ac   : > { %v5070_v21 = vsub.s32 0, %v5069_v23 }
 0x2ad   : > { %v2061_v26 = vadd.f32 %v2060_v60, %v2059_v34 }
 0x2af   : > { %v2063_v20 = vadd.f32 %v2062_v37, %v2061_v26 }
 0x2b1   : > { %v2065_v63 = vadd.f32 %v2064_v53, %v2063_v20  ;;  %v5072_v53 = vld [vmem:[#allocation30_spill] sm:$0xff] }
 0x2b3   : > { %v2067_v16 = vadd.f32 %v2066_v36, %v2065_v63  ;;  %v5073_v63 = vld [vmem:[#allocation29_spill] sm:$0xff] }
 0x2b5   : > { %v2069_v0 = vadd.f32 %v2068_v49, %v2067_v16  ;;  %v5074_v16 = vld [vmem:[#allocation28_spill] sm:$0xff] }
 0x2b7   : > { %v2070_v52 = vrot.slane %v2069_v0, 4 }
 0x2b9   : > { %v2071_v17 = vadd.f32 %v2070_v52, %v2069_v0  ;;  %v5075_v0 = vld [vmem:[#allocation25_spill] sm:$0xff] }
 0x2bb   : > { %v2072_v56 = vrot.slane %v2071_v17, 2 }
 0x2bd   : > { %v2073_v3 = vadd.f32 %v2072_v56, %v2071_v17  ;;  %v5076_v17 = vld [vmem:[#allocation23_spill] sm:$0xff] }
 0x2bf   : > { %v2074_v59 = vrot.slane %v2073_v3, 1 }
 0x2c1   : > { %v2075_v27 = vadd.f32 %v2074_v59, %v2073_v3  ;;  %v5077_v3 = vld [vmem:[#allocation22_spill] sm:$0xff] }
 0x2c3   : > { %v2077_v32 = vmul.f32 0.00390625, %v2075_v27  ;;  %v5078_v27 = vld [vmem:[#allocation21_spill] sm:$0xff] }
 0x2c5   : > { %2839 = vmatmul.mubr.msk.f32.vlgmr.msra.gmra.mxu1 %vm997_vm1, %v2077_v32 }
 0x2c6   : > { %2845 = vmatprep.mubr.msk.f32.mxu1 %vm3129_vm3, %v5068_v42  ;;  %2842 = vmatpush3.msra.mxu1 %v2162_v9 }
 0x2c7   : > { %2843 = vmatprep.subr.mxu1 %v5068_v42  ;;  %v5079_v42 = vld [vmem:[#allocation20_spill] sm:$0xff] }
 0x2c8   : > { %2844 = vmatpush3.msra.mxu1 %v2161_v14 }
 0x385   : > { %v2156_v7 = vpop.f32.mrf.mxu1 }
 0x386   : > { %v2157_v57 = vadd.f32 %v2156_v7, %v2086_v39 }
 0x387   : > { %v2840_v51 = vpop.f32.mrf.mxu1 }
 0x388   : > { %v2160_v47 = vmax.f32 %v2157_v57, 0.0  ;;  %v2289_v57 = vpop.permute.xlu1 %2288  ;;  %v2940_v51 = vld [vmem:[%s3315_s26] sm:$0xff] }
 0x38a   : > { %2846 = vmatmul.mubr.msk.f32.vlgmr.msra.gmra.mxu1 %vm515_vm0, %v2160_v47 }
 0x44a   : > { %v2233_v11 = vpop.f32.mrf.mxu1 }
 0x44b   : > { %v2234_v13 = vadd.f32 %v2233_v11, %v2163_v61 }
 0x44c   : > { %v2847_v1 = vpop.f32.mrf.mxu1 }
 0x44d   : > { %v2237_v50 = vadd.f32 3.0, %v2234_v13  ;;  %v2942_v13 = vld [vmem:[%s3315_s26 + $0x10] sm:$0xff] }
 0x44f   : > { %v2238_v48 = vmax.f32 %v2237_v50, 0.0 }
 0x451   : > { %v2239_v45 = vmin.f32 %v2238_v48, 6.0  ;;  %v2943_v48 = vld [vmem:[%s3315_s26 + $0x18] sm:$0xff] }
 0x453   : > { %v2240_v41 = vmul.f32 0.16666667, %v2239_v45 }
 0x455   : > { %v4777_v34 = vrot.slane %v2240_v41, %v5070_v21 }
 0x457   : > { %v2276_v33 = vmul.f32 %v4777_v34, %v2006_v44  ;;  %v2260_v60 = vmul.f32 %v4777_v34, %v4667_v8  ;;  %v2275_v37 = vmul.f32 %v4777_v34, %v2005_v22  ;;  %v2259_v26 = vmul.f32 %v4777_v34, %v4651_v12 }
 0x458   : > { %v2274_v20 = vmul.f32 %v4777_v34, %v2004_v29  ;;  %v2258_v8 = vmul.f32 %v4777_v34, %v4649_v15  ;;  %v2273_v44 = vmul.f32 %v4777_v34, %v4744_v62  ;;  %v2257_v22 = vmul.f32 %v4777_v34, %v4632_v28  ;;  %v5071_v29 = vld [vmem:[#allocation35_spill] sm:$0xff] }
 0x459   : > { %2734 = vmatprep.subr.msk.mxu0 %vm997_vm1, %v2276_v33  ;;  %v2272_v12 = vmul.f32 %v4777_v34, %v4742_v30  ;;  %v2256_v15 = vmul.f32 %v4777_v34, %v4630_v55  ;;  %v2271_v62 = vmul.f32 %v4777_v34, %v4736_v5  ;;  %v2255_v28 = vmul.f32 %v4777_v34, %v5066_v4 }
 0x45a   : > { %2735 = vmatpush3.xpose.msk.msra.mxu0 %vm997_vm1, %v2260_v60  ;;  %v2270_v30 = vmul.f32 %v4777_v34, %v4734_v18  ;;  %v2254_v55 = vmul.f32 %v4777_v34, %v4614_v19  ;;  %v2269_v5 = vmul.f32 %v4777_v34, %v4726_v2  ;;  %v2253_v4 = vmul.f32 %v4777_v34, %v5071_v29 }
 0x45b   : > { %2736 = vmatprep.subr.msk.mxu0 %vm997_vm1, %v2275_v37  ;;  %v2268_v18 = vmul.f32 %v4777_v34, %v4724_v40  ;;  %v2252_v19 = vmul.f32 %v4777_v34, %v5072_v53  ;;  %v2267_v2 = vmul.f32 %v4777_v34, %v4716_v24  ;;  %v2251_v36 = vmul.f32 %v4777_v34, %v5073_v63 }
 0x45c   : > { %v2266_v40 = vmul.f32 %v4777_v34, %v4714_v10  ;;  %v2250_v49 = vmul.f32 %v4777_v34, %v5074_v16  ;;  %v2265_v24 = vmul.f32 %v4777_v34, %v4703_v54  ;;  %v2249_v52 = vmul.f32 %v4777_v34, %v5075_v0 }
 0x45d   : > { %v2264_v10 = vmul.f32 %v4777_v34, %v4701_v6  ;;  %v2248_v56 = vmul.f32 %v4777_v34, %v5076_v17  ;;  %v2263_v54 = vmul.f32 %v4777_v34, %v4687_v58  ;;  %v2247_v59 = vmul.f32 %v4777_v34, %v5077_v3 }
 0x45e   : > { %2737 = vmatpush3.xpose.msk.msra.mxu0 %vm997_vm1, %v2259_v26  ;;  %v2262_v6 = vmul.f32 %v4777_v34, %v4685_v38  ;;  %v2246_v32 = vmul.f32 %v4777_v34, %v5078_v27  ;;  %v2261_v58 = vmul.f32 %v4777_v34, %v4669_v46  ;;  %v2245_v9 = vmul.f32 %v4777_v34, %v5079_v42  ;;  %v2278_v38 = vld [vmem:[%s4941_s9 + $0x8] sm:$0xff]  ;;  %v2284_v46 = vpop.permute.xlu0 %2283 }
 0x45f   : > { %2738 = vmatprep.subr.msk.mxu0 %vm997_vm1, %v2274_v20 }
 0x462   : > { %2739 = vmatpush3.xpose.msk.msra.mxu0 %vm997_vm1, %v2258_v8 }
 0x463   : > { %2740 = vmatprep.subr.msk.mxu0 %vm997_vm1, %v2273_v44 }
 0x466   : > { %2741 = vmatpush3.xpose.msk.msra.mxu0 %vm997_vm1, %v2257_v22 }
 0x467   : > { %2742 = vmatprep.subr.msk.mxu0 %vm997_vm1, %v2272_v12 }
 0x46a   : > { %2743 = vmatpush3.xpose.msk.msra.mxu0 %vm997_vm1, %v2256_v15 }
 0x46b   : > { %2744 = vmatprep.subr.msk.mxu0 %vm997_vm1, %v2271_v62 }
 0x46e   : > { %2745 = vmatpush3.xpose.msk.msra.mxu0 %vm997_vm1, %v2255_v28 }
 0x46f   : > { %2746 = vmatprep.subr.msk.mxu0 %vm997_vm1, %v2270_v30 }
 0x472   : > { %2747 = vmatpush3.xpose.msk.msra.mxu0 %vm997_vm1, %v2254_v55 }
 0x473   : > { %2748 = vmatprep.subr.msk.mxu0 %vm997_vm1, %v2269_v5 }
 0x476   : > { %2749 = vmatpush3.xpose.msk.msra.mxu0 %vm997_vm1, %v2253_v4 }
 0x477   : > { %2750 = vmatprep.subr.msk.mxu0 %vm997_vm1, %v2268_v18 }
 0x47a   : > { %2751 = vmatpush3.xpose.msk.msra.mxu0 %vm997_vm1, %v2252_v19 }
 0x47b   : > { %2752 = vmatprep.subr.msk.mxu0 %vm997_vm1, %v2267_v2 }
 0x47e   : > { %2753 = vmatpush3.xpose.msk.msra.mxu0 %vm997_vm1, %v2251_v36 }
 0x47f   : > { %2754 = vmatprep.subr.msk.mxu0 %vm997_vm1, %v2266_v40 }
 0x482   : > { %2755 = vmatpush3.xpose.msk.msra.mxu0 %vm997_vm1, %v2250_v49 }
 0x483   : > { %2756 = vmatprep.subr.msk.mxu0 %vm997_vm1, %v2265_v24 }
 0x486   : > { %2757 = vmatpush3.xpose.msk.msra.mxu0 %vm997_vm1, %v2249_v52 }
 0x487   : > { %2758 = vmatprep.subr.msk.mxu0 %vm997_vm1, %v2264_v10 }
 0x48a   : > { %2759 = vmatpush3.xpose.msk.msra.mxu0 %vm997_vm1, %v2248_v56 }
 0x48b   : > { %2760 = vmatprep.subr.msk.mxu0 %vm997_vm1, %v2263_v54 }
 0x48e   : > { %2761 = vmatpush3.xpose.msk.msra.mxu0 %vm997_vm1, %v2247_v59 }
 0x48f   : > { %2762 = vmatprep.subr.msk.mxu0 %vm997_vm1, %v2262_v6 }
 0x492   : > { %2763 = vmatpush3.xpose.msk.msra.mxu0 %vm997_vm1, %v2246_v32 }
 0x493   : > { %2764 = vmatprep.subr.msk.mxu0 %vm997_vm1, %v2261_v58 }
 0x496   : > { %2765 = vmatpush3.xpose.msk.msra.mxu0 %vm997_vm1, %v2245_v9 }
 0x499   : > { %2767 = vmatmul.mubr.msk.f32.vlgmr.msra.gmra.mxu0 %vm997_vm1, %v4765_v35  ;;  %v2941_v35 = vld [vmem:[%s3315_s26 + $0x8] sm:$0xff] }
 0x49a   : > { %2768 = vmatprep.mubr.msk.f32.mxu0 %vm997_vm1, %v2278_v38 }
 0x49d   : > { %2769 = vmatmul.mubr.msk.f32.gmra.mxu0 %vm997_vm1, %v2278_v38 }
 0x559   : > { %v2459_v14 = vpop.f32.mrf.mxu0 }
 0x55a   : > { %v2460_v39 = vadd.f32 %v2459_v14, %v2284_v46 }
 0x55b   : > { %v2461_v7 = vpop.f32.mrf.mxu0 }
 0x55c   : > { %v2470_v47 = vadd.f32 %v2940_v51, %v2460_v39  ;;  %v2462_v31 = vadd.f32 %v2461_v7, %v2284_v46 }
 0x55d   : > { %v2465_v43 = vpop.f32.mrf.mxu0 }
 0x55e   : > { %2474 = vst [vmem:[%s432_s4] sm:$0xff] %v2470_v47  ;;  %v2471_v25 = vadd.f32 %v2941_v35, %v2462_v31  ;;  %v2466_v61 = vadd.f32 %v2465_v43, %v2289_v57 }
 0x55f   : > { %v2467_v11 = vpop.f32.mrf.mxu0 }
 0x560   : > { %2475 = vst [vmem:[%s432_s4 + $0x8] sm:$0xff] %v2471_v25  ;;  %v2472_v1 = vadd.f32 %v2942_v13, %v2466_v61  ;;  %v2468_v50 = vadd.f32 %v2467_v11, %v2289_v57 }
 0x562   : > { %2476 = vst [vmem:[%s432_s4 + $0x10] sm:$0xff] %v2472_v1  ;;  %v2473_v45 = vadd.f32 %v2943_v48, %v2468_v50 }
 0x564   : > { %2477 = vst [vmem:[%s432_s4 + $0x18] sm:$0xff] %v2473_v45 }
 0x565   : > { %3061 = shalt.err (!%p3058_p6)
}
 0x566   : > { %s3062_s26 = scalar_lea.hbm %s4890_s14, 512  ;;  %s3066_s15 = scalar_lea.hbm %s4943_s11, 1024 }
 0x567   : > { %p3063_p13 = scmp.ne.s32.totalorder %s4890_s14, %s3062_s26  ;;  %p3067_p8 = scmp.lt.s32.totalorder %s4890_s14, %s4943_s11 }
 0x568   : > { %p3068_p12 = scmp.lt.s32.totalorder %s3066_s15, %s3062_s26 }
 0x569   : > { %p3064_p5 = pnand %p3063_p13, %p5080_p0 }
 0x56a   : > { %p3069_p10 = por %p3068_p12, %p3067_p8 }
 0x56b   : > { %p3065_p7 = pneg %p3064_p5 }
 0x56d   : > { %p3070_p11 = pnand %p3069_p10, %p3065_p7 }
 0x56f   : > { %3073 = shalt.err (!%p3070_p11)
}
 0x570   : > { %s3132_s21 = smov 256   ;;  %s3133_s24 = smov 16  }
 0x571   : > { %2864 = dma.vmem_to_hbm [thread:$0]  (%p5080_p0), %s4884_s29, 512, %s4890_s14, %s4892_s16, %s3132_s21, %s3132_s21, %s3133_s24  }
 0x572 PF: > { %p2891_p1 = scmp.ge.s32.totalorder %s3120_s20, 2  ;;  %s2507_s25 = sand.u32 1, %s3108_s17  }
 0x573   : > { %p5081_p3 = scmp.ne.s32.totalorder %s4973_s28, 0  ;;  %s2508_s13 = scalar_lea.sflag [#allocation5], %s2507_s25 }
 0x575   : > { %p2880_p2 = pnand %p2891_p1, %p5081_p3 }
 0x577   : > { %p2881_p9 = pneg %p2880_p2 }
 0x579   : > { %3103 = dma.done.wait (%p2881_p9), %s2508_s13, 512  }
 0x57a   : > { %3105 = vsyncadd (%p2881_p9), %s2508_s13, 4294966784  ;;  %s5082_s26 = sld [smem:[#allocation16_spill]]  ;;  %p24_p4 = scmp.ge.s32.totalorder %s3219_s23, 4  }
 0x57b   : > { %s5083_s17 = smov %s3112_s18  ;;  %s5084_s18 = smov %s3116_s19 }
 0x57c   : > { %s5086_s20 = smov %s3219_s23  ;;  %26 = sbr.rel (!%p24_p4) target bundleno = 8 (0x8), region = 117 }
 0x580   : > { %s5085_s19 = smov %s5082_s26 }
 0x581   :  { %2513 = vsyncpa [#allocation4], 1 }
 0x582   :  { %2515 = vsyncpa [#allocation4 + $0x1], 1 }
 0x583   :  { %2516 = vsyncpa [#allocation7], 1 }
 0x584   :  { %2517 = vsyncpa [#allocation10], 1 }
 0x585   :  { %2518 = vsyncpa [#allocation5], 1 }
 0x586   :  { %2520 = vsyncpa [#allocation5 + $0x1], 1 }

</bundles_post_ra>
